<compile_context>
chip_gen: v7x
topology: tpu7x:2x2x1
jax: 0.10.0
libtpu: 0.0.40
codegen_flags: <defaults>
</compile_context>

<pallas_src>
from functools import partial
import math
import numpy as np

import jax
import jax.numpy as jnp
from jax.experimental import pallas as pl
from jax.experimental.pallas import tpu as pltpu


# ----------------------------------------------------------------------------
# Glue: exact port of SerializedAttention.get_padding_and_inverse (numpy, no grad)
# ----------------------------------------------------------------------------
def get_padding_and_inverse(offset, patch_size):
    offset = np.asarray(offset, dtype=np.int64)
    K = int(patch_size)
    bincount = np.diff(offset, prepend=0)
    bincount_pad = (bincount + K - 1) // K * K
    mask_pad = bincount > K
    bincount_pad = (~mask_pad) * bincount + mask_pad * bincount_pad
    _offset = np.concatenate([[0], offset])
    _offset_pad = np.concatenate([[0], np.cumsum(bincount_pad)])
    pad = np.arange(_offset_pad[-1])
    unpad = np.arange(_offset[-1])
    cu_seqlens = []
    for i in range(len(offset)):
        unpad[_offset[i]:_offset[i + 1]] += _offset_pad[i] - _offset[i]
        if bincount[i] != bincount_pad[i]:
            pad[_offset_pad[i + 1] - K + bincount[i] % K:_offset_pad[i + 1]] = \
                pad[_offset_pad[i + 1] - 2 * K + bincount[i] % K:_offset_pad[i + 1] - K]
        pad[_offset_pad[i]:_offset_pad[i + 1]] -= _offset_pad[i] - _offset[i]
        cu_seqlens.append(np.arange(_offset_pad[i], _offset_pad[i + 1], K, dtype=np.int32))
    cu_seqlens = np.concatenate(
        cu_seqlens + [np.array([_offset_pad[-1]], dtype=np.int64)]).astype(np.int32)
    return pad, unpad, cu_seqlens


# ----------------------------------------------------------------------------
# Fused Pallas kernel: per patch-block
#   x (rows, C) --MXU--> qkv (rows, 3C) --per-head attention--> o (rows, C)
#   --MXU--> proj(o) (rows, C)
# rows = pb * K ; heads processed one at a time so only one fp32 (pb, K, K) score
# tile is live at any moment (VMEM friendly for large K).
# ----------------------------------------------------------------------------
def _fused_attn_kernel(x_ref, wqkv_ref, bqkv_ref, wproj_ref, bproj_ref,
                       o_ref, head_out_ref,
                       *, pb, k_sz, n_heads, d_head, scale):
    C = n_heads * d_head
    x = x_ref[...]                                               # (rows, C)
    # qkv projection on the MXU (fp32 accumulation), cast back to activation dtype
    qkv = (jnp.dot(x, wqkv_ref[...], preferred_element_type=jnp.float32)
           + bqkv_ref[...]).astype(x.dtype)                      # (rows, 3C)

    for h in range(n_heads):                                     # static unroll, H small
        q = qkv[:, h * d_head:(h + 1) * d_head]
        k = qkv[:, C + h * d_head:C + (h + 1) * d_head]
        v = qkv[:, 2 * C + h * d_head:2 * C + (h + 1) * d_head]
        # upcast_attention: q, k -> fp32 before the scaled dot product
        q = q.reshape(pb, k_sz, d_head).astype(jnp.float32) * scale
        k = k.reshape(pb, k_sz, d_head).astype(jnp.float32)
        v = v.reshape(pb, k_sz, d_head)
        s = jnp.einsum("pqd,pkd->pqk", q, k,
                       preferred_element_type=jnp.float32)       # (pb, K, K)
        # upcast_softmax: fp32, numerically-stable form (matches torch softmax)
        s = s - jnp.max(s, axis=-1, keepdims=True)
        p = jnp.exp(s)
        p = p * pl.reciprocal(jnp.sum(p, axis=-1, keepdims=True), approx=True)  # EUP vrcp
        p = p.astype(v.dtype)                                    # attn_drop(p=0.0) identity
        o = jnp.einsum("pqk,pkd->pqd", p, v,
                       preferred_element_type=jnp.float32)       # (pb, K, D)
        head_out_ref[:, h * d_head:(h + 1) * d_head] = (
            o.reshape(pb * k_sz, d_head).astype(head_out_ref.dtype))

    # Output projection, fused (a row-wise Linear commutes with the `inverse` row
    # gather that is applied outside the kernel).  proj_drop(p=0.0) is identity.
    out = (jnp.dot(head_out_ref[...], wproj_ref[...],
                   preferred_element_type=jnp.float32) + bproj_ref[...])
    o_ref[...] = out.astype(o_ref.dtype)


def _choose_patch_block(num_patches, k_sz, channels, dtype_bytes,
                        budget_bytes=10 * 1024 * 1024):
    """Patches per grid step: as many as fit the VMEM budget, with rows = PB*K a
    multiple of 8 (or the whole array, which is always layout-legal)."""
    align = 8 // math.gcd(k_sz, 8)

    def block_bytes(pb_):
        rows = pb_ * k_sz
        io = 2 * 2 * rows * channels * dtype_bytes            # in/out, double-buffered
        work = rows * 3 * channels * 4                         # fp32 qkv intermediate
        work += 6 * rows * channels * 4                        # per-head fp32 temporaries
        work += 3 * pb_ * k_sz * k_sz * 4                      # score / prob tiles
        work += rows * channels * dtype_bytes                  # head-output scratch
        return io + work

    pb = align
    while pb + align <= num_patches and block_bytes(pb + align) <= budget_bytes:
        pb += align
    return min(pb, num_patches)


def fused_serialized_attention(feat_ser, w_qkv, b_qkv, w_proj, b_proj,
                               *, num_patches, patch_k, num_heads, head_dim, scale):
    n_rows, C = feat_ser.shape
    assert C == num_heads * head_dim and n_rows == num_patches * patch_k
    pb = _choose_patch_block(num_patches, patch_k, C, feat_ser.dtype.itemsize)
    rows_blk = pb * patch_k
    grid = (pl.cdiv(num_patches, pb),)
    cost = pl.CostEstimate(
        flops=int(2 * n_rows * C * 3 * C
                  + 4 * num_patches * num_heads * patch_k * patch_k * head_dim
                  + 2 * n_rows * C * C),
        transcendentals=int(num_patches * num_heads * patch_k * patch_k),
        bytes_accessed=int(feat_ser.dtype.itemsize
                           * (2 * n_rows * C + 4 * C * C + 4 * C)),
    )
    return pl.pallas_call(
        partial(_fused_attn_kernel, pb=pb, k_sz=patch_k,
                n_heads=num_heads, d_head=head_dim, scale=scale),
        out_shape=jax.ShapeDtypeStruct((n_rows, C), feat_ser.dtype),
        grid=grid,
        in_specs=[
            pl.BlockSpec((rows_blk, C), lambda i: (i, 0)),      # row tile (pipelined)
            pl.BlockSpec((C, 3 * C), lambda i: (0, 0)),         # w_qkv: resident in VMEM
            pl.BlockSpec((1, 3 * C), lambda i: (0, 0)),         # b_qkv
            pl.BlockSpec((C, C), lambda i: (0, 0)),             # w_proj
            pl.BlockSpec((1, C), lambda i: (0, 0)),             # b_proj
        ],
        out_specs=pl.BlockSpec((rows_blk, C), lambda i: (i, 0)),
        scratch_shapes=[pltpu.VMEM((rows_blk, C), feat_ser.dtype)],
        compiler_params=pltpu.CompilerParams(
            dimension_semantics=("parallel",),                  # shard blocks across TCs
            vmem_limit_bytes=32 * 1024 * 1024,
        ),
        cost_estimate=cost,
    )(feat_ser, w_qkv, b_qkv.reshape(1, 3 * C), w_proj, b_proj.reshape(1, C))


# ----------------------------------------------------------------------------
# Full SerializedAttention forward (non-flash branch, enable_rpe=False)
# ----------------------------------------------------------------------------
def serialized_attention_forward(feat, offset, serialized_order, serialized_inverse,
                                 w_qkv, b_qkv, w_proj, b_proj,
                                 *, num_heads, patch_size_max, qk_scale=None):
    C = feat.shape[1]
    H = num_heads
    D = C // H
    scale = qk_scale if qk_scale is not None else D ** -0.5

    # patch_size = min(bincount.min(), patch_size_max)   (non-flash branch)
    bincount = np.diff(np.asarray(offset, dtype=np.int64), prepend=0)
    K = int(min(int(bincount.min()), patch_size_max))

    pad, unpad, _cu_seqlens = get_padding_and_inverse(offset, K)
    order = np.asarray(serialized_order)[pad]          # (N_pad,)
    inverse = unpad[np.asarray(serialized_inverse)]    # (N,)

    # Gather into serialized+padded order BEFORE the fused kernel: row-wise Linears
    # commute with row gathers, so qkv(feat)[order] == qkv(feat[order]) and
    # proj(o)[inverse] == proj(o[inverse]); the XLA gathers only move C channels/row.
    # TODO(synk): fuse these two gathers into the kernel's own DMA (scalar-prefetched
    #             row indices) instead of XLA-level gathers.
    feat_ser = feat[jnp.asarray(order, dtype=jnp.int32)]          # (N_pad, C)

    P = feat_ser.shape[0] // K
    out_pad = fused_serialized_attention(
        feat_ser, w_qkv, b_qkv, w_proj, b_proj,
        num_patches=P, patch_k=K, num_heads=H, head_dim=D, scale=scale)  # (N_pad, C)

    feat_out = out_pad[jnp.asarray(inverse, dtype=jnp.int32)]     # (N, C) un-pad/de-serialize
    return feat_out

# TODO(synk): flash_attn varlen path and the RPE bias table are not implemented
#             (enable_flash=False / enable_rpe=False configuration is reproduced).


# ----------------------------------------------------------------------------
# Pure-JAX reference (mirrors the torch non-flash branch) for a sanity check
# ----------------------------------------------------------------------------
def _reference_forward(feat, order, inverse, w_qkv, b_qkv, w_proj, b_proj,
                       num_heads, K, scale):
    C = feat.shape[1]
    H = num_heads
    D = C // H
    qkv = (feat @ w_qkv + b_qkv)[order]
    qkv5 = jnp.transpose(qkv.reshape(-1, K, 3, H, D), (2, 0, 3, 1, 4))
    q, k, v = qkv5[0], qkv5[1], qkv5[2]
    q = q.astype(jnp.float32) * scale
    k = k.astype(jnp.float32)
    attn = jnp.einsum("phqd,phkd->phqk", q, k)
    attn = jax.nn.softmax(attn, axis=-1).astype(qkv.dtype)
    o = jnp.einsum("phqk,phkd->phqd", attn, v)
    o = jnp.transpose(o, (0, 2, 1, 3)).reshape(-1, C)
    return o[inverse] @ w_proj + b_proj


if __name__ == "__main__":
    # Small config: channels=32, num_heads=4 (head_dim=8), patch_size=8,
    # two point clouds with 10 and 14 points (offset = [10, 24]).
    C, H, PATCH = 32, 4, 8
    offset = np.array([10, 24], dtype=np.int64)
    N = int(offset[-1])

    key = jax.random.PRNGKey(0)
    k1, k2, k3, k4, k5, k6 = jax.random.split(key, 6)

    feat = jax.random.normal(k1, (N, C), dtype=jnp.float32)
    # qkv Linear: torch weight is (3C, C); stored here pre-transposed as (C, 3C)
    w_qkv = 0.02 * jax.random.normal(k2, (C, 3 * C), dtype=jnp.float32)
    b_qkv = 0.02 * jax.random.normal(k3, (3 * C,), dtype=jnp.float32)
    w_proj = 0.02 * jax.random.normal(k4, (C, C), dtype=jnp.float32)
    b_proj = 0.02 * jax.random.normal(k5, (C,), dtype=jnp.float32)

    # synthetic serialization: a random permutation of points and its inverse
    serialized_order = np.asarray(jax.random.permutation(k6, N))
    serialized_inverse = np.argsort(serialized_order)

    out = serialized_attention_forward(
        feat, offset, serialized_order, serialized_inverse,
        w_qkv, b_qkv, w_proj, b_proj,
        num_heads=H, patch_size_max=PATCH)
    out = jax.block_until_ready(out)
    assert out.shape == (N, C) and out.dtype == jnp.float32

    # numerical sanity check against the pure-JAX reference of the same branch
    bincount = np.diff(offset, prepend=0)
    K = int(min(int(bincount.min()), PATCH))
    pad, unpad, _ = get_padding_and_inverse(offset, K)
    order = np.asarray(serialized_order)[pad]
    inverse = unpad[np.asarray(serialized_inverse)]
    ref = _reference_forward(feat, jnp.asarray(order), jnp.asarray(inverse),
                             w_qkv, b_qkv, w_proj, b_proj, H, K, (C // H) ** -0.5)
    np.testing.assert_allclose(np.asarray(out), np.asarray(ref), rtol=2e-2, atol=2e-4)
    print("KERNEL_OK")
</pallas_src>

<mosaic_0001>
module attributes {stable_mosaic.version = 11 : i64} {
  func.func @_fused_attn_kernel(%arg0: i32, %arg1: memref<32x32xf32, #tpu.memory_space<vmem>>, %arg2: memref<32x96xf32, #tpu.memory_space<vmem>>, %arg3: memref<1x96xf32, #tpu.memory_space<vmem>>, %arg4: memref<32x32xf32, #tpu.memory_space<vmem>>, %arg5: memref<1x32xf32, #tpu.memory_space<vmem>>, %arg6: memref<32x32xf32, #tpu.memory_space<vmem>>, %arg7: memref<32x32xf32, #tpu.memory_space<vmem>>) attributes {dimension_semantics = [#tpu.dimension_semantics<parallel>], iteration_bounds = array<i64: 1>, scalar_prefetch = 0 : i64, scratch_operands = 1 : i64, tpu.core_type = #tpu.core_type<tc>, window_params = [{transform_indices = @transform_0, window_bounds = array<i64: 32, 32>}, {pipeline_mode = #tpu.pipeline_mode<synchronous>, transform_indices = @transform_1, window_bounds = array<i64: 32, 96>}, {pipeline_mode = #tpu.pipeline_mode<synchronous>, transform_indices = @transform_2, window_bounds = array<i64: 1, 96>}, {pipeline_mode = #tpu.pipeline_mode<synchronous>, transform_indices = @transform_3, window_bounds = array<i64: 32, 32>}, {pipeline_mode = #tpu.pipeline_mode<synchronous>, transform_indices = @transform_4, window_bounds = array<i64: 1, 32>}, {transform_indices = @transform_5, window_bounds = array<i64: 32, 32>}]} {
    %c0 = arith.constant 0 : index
    %c0_0 = arith.constant 0 : index
    %0 = vector.load %arg1[%c0, %c0_0] : memref<32x32xf32, #tpu.memory_space<vmem>>, vector<32x32xf32>
    %c0_1 = arith.constant 0 : index
    %c0_2 = arith.constant 0 : index
    %1 = vector.load %arg2[%c0_1, %c0_2] : memref<32x96xf32, #tpu.memory_space<vmem>>, vector<32x96xf32>
    %cst = arith.constant dense<0.000000e+00> : vector<32x96xf32>
    %2 = tpu.matmul %0, %1, %cst {dimension_numbers = #tpu.dot_dimension_numbers<[1], [0], [0], [1], [0, 0, 1, 1], [], []>} : vector<32x32xf32>, vector<32x96xf32>, vector<32x96xf32> -> vector<32x96xf32>
    %c0_3 = arith.constant 0 : index
    %c0_4 = arith.constant 0 : index
    %3 = vector.load %arg3[%c0_3, %c0_4] : memref<1x96xf32, #tpu.memory_space<vmem>>, vector<1x96xf32>
    %4 = vector.broadcast %3 : vector<1x96xf32> to vector<32x96xf32>
    %5 = arith.addf %2, %4 : vector<32x96xf32>
    %6 = vector.extract_strided_slice %5 {offsets = [0, 0], sizes = [32, 8], strides = [1, 1]} : vector<32x96xf32> to vector<32x8xf32>
    %7 = vector.extract_strided_slice %5 {offsets = [0, 32], sizes = [32, 8], strides = [1, 1]} : vector<32x96xf32> to vector<32x8xf32>
    %8 = vector.extract_strided_slice %5 {offsets = [0, 64], sizes = [32, 8], strides = [1, 1]} : vector<32x96xf32> to vector<32x8xf32>
    %9 = vector.shape_cast %6 : vector<32x8xf32> to vector<4x8x8xf32>
    %cst_5 = arith.constant 0.353553385 : f32
    %10 = vector.broadcast %cst_5 : f32 to vector<4x8x8xf32>
    %11 = arith.mulf %9, %10 : vector<4x8x8xf32>
    %12 = vector.shape_cast %7 : vector<32x8xf32> to vector<4x8x8xf32>
    %13 = vector.shape_cast %8 : vector<32x8xf32> to vector<4x8x8xf32>
    "tpu.trace_start"() <{level = 10 : i32, message = "pqd,pkd->pqk"}> : () -> ()
    %cst_6 = arith.constant dense<0.000000e+00> : vector<4x8x8xf32>
    %14 = tpu.matmul %11, %12, %cst_6 {dimension_numbers = #tpu.dot_dimension_numbers<[2], [2], [1], [1], [0, 0, 0, 1, 1, 1], [0], [0]>} : vector<4x8x8xf32>, vector<4x8x8xf32>, vector<4x8x8xf32> -> vector<4x8x8xf32>
    "tpu.trace_stop"() : () -> ()
    %cst_7 = arith.constant dense<0xFF800000> : vector<4x8xf32>
    %15 = vector.multi_reduction <maximumf>, %14, %cst_7 [2] : vector<4x8x8xf32> to vector<4x8xf32>
    %16 = vector.shape_cast %15 : vector<4x8xf32> to vector<4x8x1xf32>
    %17 = vector.broadcast %16 : vector<4x8x1xf32> to vector<4x8x8xf32>
    %18 = arith.subf %14, %17 : vector<4x8x8xf32>
    %19 = math.exp %18 : vector<4x8x8xf32>
    %cst_8 = arith.constant dense<0.000000e+00> : vector<4x8xf32>
    %20 = vector.multi_reduction <add>, %19, %cst_8 [2] : vector<4x8x8xf32> to vector<4x8xf32>
    %21 = vector.shape_cast %20 : vector<4x8xf32> to vector<4x8x1xf32>
    %22 = tpu.reciprocal %21 {approx = true} : vector<4x8x1xf32> -> vector<4x8x1xf32>
    %23 = vector.broadcast %22 : vector<4x8x1xf32> to vector<4x8x8xf32>
    %24 = arith.mulf %19, %23 : vector<4x8x8xf32>
    "tpu.trace_start"() <{level = 10 : i32, message = "pqk,pkd->pqd"}> : () -> ()
    %cst_9 = arith.constant dense<0.000000e+00> : vector<4x8x8xf32>
    %25 = tpu.matmul %24, %13, %cst_9 {dimension_numbers = #tpu.dot_dimension_numbers<[2], [1], [1], [2], [0, 0, 0, 1, 1, 2], [0], [0]>} : vector<4x8x8xf32>, vector<4x8x8xf32>, vector<4x8x8xf32> -> vector<4x8x8xf32>
    "tpu.trace_stop"() : () -> ()
    %26 = vector.shape_cast %25 : vector<4x8x8xf32> to vector<32x8xf32>
    %c0_10 = arith.constant 0 : index
    %c0_11 = arith.constant 0 : index
    %27 = vector.load %arg7[%c0_10, %c0_11] : memref<32x32xf32, #tpu.memory_space<vmem>>, vector<32x8xf32>
    tpu.vector_store %arg7[%c0_10, %c0_11], %26 {strides = array<i32>} : memref<32x32xf32, #tpu.memory_space<vmem>>, vector<32x8xf32>,
    %28 = vector.extract_strided_slice %5 {offsets = [0, 8], sizes = [32, 8], strides = [1, 1]} : vector<32x96xf32> to vector<32x8xf32>
    %29 = vector.extract_strided_slice %5 {offsets = [0, 40], sizes = [32, 8], strides = [1, 1]} : vector<32x96xf32> to vector<32x8xf32>
    %30 = vector.extract_strided_slice %5 {offsets = [0, 72], sizes = [32, 8], strides = [1, 1]} : vector<32x96xf32> to vector<32x8xf32>
    %31 = vector.shape_cast %28 : vector<32x8xf32> to vector<4x8x8xf32>
    %cst_12 = arith.constant 0.353553385 : f32
    %32 = vector.broadcast %cst_12 : f32 to vector<4x8x8xf32>
    %33 = arith.mulf %31, %32 : vector<4x8x8xf32>
    %34 = vector.shape_cast %29 : vector<32x8xf32> to vector<4x8x8xf32>
    %35 = vector.shape_cast %30 : vector<32x8xf32> to vector<4x8x8xf32>
    "tpu.trace_start"() <{level = 10 : i32, message = "pqd,pkd->pqk"}> : () -> ()
    %cst_13 = arith.constant dense<0.000000e+00> : vector<4x8x8xf32>
    %36 = tpu.matmul %33, %34, %cst_13 {dimension_numbers = #tpu.dot_dimension_numbers<[2], [2], [1], [1], [0, 0, 0, 1, 1, 1], [0], [0]>} : vector<4x8x8xf32>, vector<4x8x8xf32>, vector<4x8x8xf32> -> vector<4x8x8xf32>
    "tpu.trace_stop"() : () -> ()
    %cst_14 = arith.constant dense<0xFF800000> : vector<4x8xf32>
    %37 = vector.multi_reduction <maximumf>, %36, %cst_14 [2] : vector<4x8x8xf32> to vector<4x8xf32>
    %38 = vector.shape_cast %37 : vector<4x8xf32> to vector<4x8x1xf32>
    %39 = vector.broadcast %38 : vector<4x8x1xf32> to vector<4x8x8xf32>
    %40 = arith.subf %36, %39 : vector<4x8x8xf32>
    %41 = math.exp %40 : vector<4x8x8xf32>
    %cst_15 = arith.constant dense<0.000000e+00> : vector<4x8xf32>
    %42 = vector.multi_reduction <add>, %41, %cst_15 [2] : vector<4x8x8xf32> to vector<4x8xf32>
    %43 = vector.shape_cast %42 : vector<4x8xf32> to vector<4x8x1xf32>
    %44 = tpu.reciprocal %43 {approx = true} : vector<4x8x1xf32> -> vector<4x8x1xf32>
    %45 = vector.broadcast %44 : vector<4x8x1xf32> to vector<4x8x8xf32>
    %46 = arith.mulf %41, %45 : vector<4x8x8xf32>
    "tpu.trace_start"() <{level = 10 : i32, message = "pqk,pkd->pqd"}> : () -> ()
    %cst_16 = arith.constant dense<0.000000e+00> : vector<4x8x8xf32>
    %47 = tpu.matmul %46, %35, %cst_16 {dimension_numbers = #tpu.dot_dimension_numbers<[2], [1], [1], [2], [0, 0, 0, 1, 1, 2], [0], [0]>} : vector<4x8x8xf32>, vector<4x8x8xf32>, vector<4x8x8xf32> -> vector<4x8x8xf32>
    "tpu.trace_stop"() : () -> ()
    %48 = vector.shape_cast %47 : vector<4x8x8xf32> to vector<32x8xf32>
    %c0_17 = arith.constant 0 : index
    %c8 = arith.constant 8 : index
    %49 = vector.load %arg7[%c0_17, %c8] : memref<32x32xf32, #tpu.memory_space<vmem>>, vector<32x8xf32>
    tpu.vector_store %arg7[%c0_17, %c8], %48 {strides = array<i32>} : memref<32x32xf32, #tpu.memory_space<vmem>>, vector<32x8xf32>,
    %50 = vector.extract_strided_slice %5 {offsets = [0, 16], sizes = [32, 8], strides = [1, 1]} : vector<32x96xf32> to vector<32x8xf32>
    %51 = vector.extract_strided_slice %5 {offsets = [0, 48], sizes = [32, 8], strides = [1, 1]} : vector<32x96xf32> to vector<32x8xf32>
    %52 = vector.extract_strided_slice %5 {offsets = [0, 80], sizes = [32, 8], strides = [1, 1]} : vector<32x96xf32> to vector<32x8xf32>
    %53 = vector.shape_cast %50 : vector<32x8xf32> to vector<4x8x8xf32>
    %cst_18 = arith.constant 0.353553385 : f32
    %54 = vector.broadcast %cst_18 : f32 to vector<4x8x8xf32>
    %55 = arith.mulf %53, %54 : vector<4x8x8xf32>
    %56 = vector.shape_cast %51 : vector<32x8xf32> to vector<4x8x8xf32>
    %57 = vector.shape_cast %52 : vector<32x8xf32> to vector<4x8x8xf32>
    "tpu.trace_start"() <{level = 10 : i32, message = "pqd,pkd->pqk"}> : () -> ()
    %cst_19 = arith.constant dense<0.000000e+00> : vector<4x8x8xf32>
    %58 = tpu.matmul %55, %56, %cst_19 {dimension_numbers = #tpu.dot_dimension_numbers<[2], [2], [1], [1], [0, 0, 0, 1, 1, 1], [0], [0]>} : vector<4x8x8xf32>, vector<4x8x8xf32>, vector<4x8x8xf32> -> vector<4x8x8xf32>
    "tpu.trace_stop"() : () -> ()
    %cst_20 = arith.constant dense<0xFF800000> : vector<4x8xf32>
    %59 = vector.multi_reduction <maximumf>, %58, %cst_20 [2] : vector<4x8x8xf32> to vector<4x8xf32>
    %60 = vector.shape_cast %59 : vector<4x8xf32> to vector<4x8x1xf32>
    %61 = vector.broadcast %60 : vector<4x8x1xf32> to vector<4x8x8xf32>
    %62 = arith.subf %58, %61 : vector<4x8x8xf32>
    %63 = math.exp %62 : vector<4x8x8xf32>
    %cst_21 = arith.constant dense<0.000000e+00> : vector<4x8xf32>
    %64 = vector.multi_reduction <add>, %63, %cst_21 [2] : vector<4x8x8xf32> to vector<4x8xf32>
    %65 = vector.shape_cast %64 : vector<4x8xf32> to vector<4x8x1xf32>
    %66 = tpu.reciprocal %65 {approx = true} : vector<4x8x1xf32> -> vector<4x8x1xf32>
    %67 = vector.broadcast %66 : vector<4x8x1xf32> to vector<4x8x8xf32>
    %68 = arith.mulf %63, %67 : vector<4x8x8xf32>
    "tpu.trace_start"() <{level = 10 : i32, message = "pqk,pkd->pqd"}> : () -> ()
    %cst_22 = arith.constant dense<0.000000e+00> : vector<4x8x8xf32>
    %69 = tpu.matmul %68, %57, %cst_22 {dimension_numbers = #tpu.dot_dimension_numbers<[2], [1], [1], [2], [0, 0, 0, 1, 1, 2], [0], [0]>} : vector<4x8x8xf32>, vector<4x8x8xf32>, vector<4x8x8xf32> -> vector<4x8x8xf32>
    "tpu.trace_stop"() : () -> ()
    %70 = vector.shape_cast %69 : vector<4x8x8xf32> to vector<32x8xf32>
    %c0_23 = arith.constant 0 : index
    %c16 = arith.constant 16 : index
    %71 = vector.load %arg7[%c0_23, %c16] : memref<32x32xf32, #tpu.memory_space<vmem>>, vector<32x8xf32>
    tpu.vector_store %arg7[%c0_23, %c16], %70 {strides = array<i32>} : memref<32x32xf32, #tpu.memory_space<vmem>>, vector<32x8xf32>,
    %72 = vector.extract_strided_slice %5 {offsets = [0, 24], sizes = [32, 8], strides = [1, 1]} : vector<32x96xf32> to vector<32x8xf32>
    %73 = vector.extract_strided_slice %5 {offsets = [0, 56], sizes = [32, 8], strides = [1, 1]} : vector<32x96xf32> to vector<32x8xf32>
    %74 = vector.extract_strided_slice %5 {offsets = [0, 88], sizes = [32, 8], strides = [1, 1]} : vector<32x96xf32> to vector<32x8xf32>
    %75 = vector.shape_cast %72 : vector<32x8xf32> to vector<4x8x8xf32>
    %cst_24 = arith.constant 0.353553385 : f32
    %76 = vector.broadcast %cst_24 : f32 to vector<4x8x8xf32>
    %77 = arith.mulf %75, %76 : vector<4x8x8xf32>
    %78 = vector.shape_cast %73 : vector<32x8xf32> to vector<4x8x8xf32>
    %79 = vector.shape_cast %74 : vector<32x8xf32> to vector<4x8x8xf32>
    "tpu.trace_start"() <{level = 10 : i32, message = "pqd,pkd->pqk"}> : () -> ()
    %cst_25 = arith.constant dense<0.000000e+00> : vector<4x8x8xf32>
    %80 = tpu.matmul %77, %78, %cst_25 {dimension_numbers = #tpu.dot_dimension_numbers<[2], [2], [1], [1], [0, 0, 0, 1, 1, 1], [0], [0]>} : vector<4x8x8xf32>, vector<4x8x8xf32>, vector<4x8x8xf32> -> vector<4x8x8xf32>
    "tpu.trace_stop"() : () -> ()
    %cst_26 = arith.constant dense<0xFF800000> : vector<4x8xf32>
    %81 = vector.multi_reduction <maximumf>, %80, %cst_26 [2] : vector<4x8x8xf32> to vector<4x8xf32>
    %82 = vector.shape_cast %81 : vector<4x8xf32> to vector<4x8x1xf32>
    %83 = vector.broadcast %82 : vector<4x8x1xf32> to vector<4x8x8xf32>
    %84 = arith.subf %80, %83 : vector<4x8x8xf32>
    %85 = math.exp %84 : vector<4x8x8xf32>
    %cst_27 = arith.constant dense<0.000000e+00> : vector<4x8xf32>
    %86 = vector.multi_reduction <add>, %85, %cst_27 [2] : vector<4x8x8xf32> to vector<4x8xf32>
    %87 = vector.shape_cast %86 : vector<4x8xf32> to vector<4x8x1xf32>
    %88 = tpu.reciprocal %87 {approx = true} : vector<4x8x1xf32> -> vector<4x8x1xf32>
    %89 = vector.broadcast %88 : vector<4x8x1xf32> to vector<4x8x8xf32>
    %90 = arith.mulf %85, %89 : vector<4x8x8xf32>
    "tpu.trace_start"() <{level = 10 : i32, message = "pqk,pkd->pqd"}> : () -> ()
    %cst_28 = arith.constant dense<0.000000e+00> : vector<4x8x8xf32>
    %91 = tpu.matmul %90, %79, %cst_28 {dimension_numbers = #tpu.dot_dimension_numbers<[2], [1], [1], [2], [0, 0, 0, 1, 1, 2], [0], [0]>} : vector<4x8x8xf32>, vector<4x8x8xf32>, vector<4x8x8xf32> -> vector<4x8x8xf32>
    "tpu.trace_stop"() : () -> ()
    %92 = vector.shape_cast %91 : vector<4x8x8xf32> to vector<32x8xf32>
    %c0_29 = arith.constant 0 : index
    %c24 = arith.constant 24 : index
    %93 = vector.load %arg7[%c0_29, %c24] : memref<32x32xf32, #tpu.memory_space<vmem>>, vector<32x8xf32>
    tpu.vector_store %arg7[%c0_29, %c24], %92 {strides = array<i32>} : memref<32x32xf32, #tpu.memory_space<vmem>>, vector<32x8xf32>,
    %c0_30 = arith.constant 0 : index
    %c0_31 = arith.constant 0 : index
    %94 = vector.load %arg7[%c0_30, %c0_31] : memref<32x32xf32, #tpu.memory_space<vmem>>, vector<32x32xf32>
    %c0_32 = arith.constant 0 : index
    %c0_33 = arith.constant 0 : index
    %95 = vector.load %arg4[%c0_32, %c0_33] : memref<32x32xf32, #tpu.memory_space<vmem>>, vector<32x32xf32>
    %cst_34 = arith.constant dense<0.000000e+00> : vector<32x32xf32>
    %96 = tpu.matmul %94, %95, %cst_34 {dimension_numbers = #tpu.dot_dimension_numbers<[1], [0], [0], [1], [0, 0, 1, 1], [], []>} : vector<32x32xf32>, vector<32x32xf32>, vector<32x32xf32> -> vector<32x32xf32>
    %c0_35 = arith.constant 0 : index
    %c0_36 = arith.constant 0 : index
    %97 = vector.load %arg5[%c0_35, %c0_36] : memref<1x32xf32, #tpu.memory_space<vmem>>, vector<1x32xf32>
    %98 = vector.broadcast %97 : vector<1x32xf32> to vector<32x32xf32>
    %99 = arith.addf %96, %98 : vector<32x32xf32>
    %c0_37 = arith.constant 0 : index
    %c0_38 = arith.constant 0 : index
    %100 = vector.load %arg6[%c0_37, %c0_38] : memref<32x32xf32, #tpu.memory_space<vmem>>, vector<32x32xf32>
    tpu.vector_store %arg6[%c0_37, %c0_38], %99 {strides = array<i32>} : memref<32x32xf32, #tpu.memory_space<vmem>>, vector<32x32xf32>,
    return
  }
  func.func @transform_0(%arg0: i32) -> (i32, i32) {
    %c0_i32 = arith.constant 0 : i32
    %c0_i32_0 = arith.constant 0 : i32
    return %arg0, %c0_i32 : i32, i32
  }
  func.func @transform_1(%arg0: i32) -> (i32, i32) {
    %c0_i32 = arith.constant 0 : i32
    %c0_i32_0 = arith.constant 0 : i32
    %c0_i32_1 = arith.constant 0 : i32
    return %c0_i32, %c0_i32_0 : i32, i32
  }
  func.func @transform_2(%arg0: i32) -> (i32, i32) {
    %c0_i32 = arith.constant 0 : i32
    %c0_i32_0 = arith.constant 0 : i32
    %c0_i32_1 = arith.constant 0 : i32
    return %c0_i32, %c0_i32_0 : i32, i32
  }
  func.func @transform_3(%arg0: i32) -> (i32, i32) {
    %c0_i32 = arith.constant 0 : i32
    %c0_i32_0 = arith.constant 0 : i32
    %c0_i32_1 = arith.constant 0 : i32
    return %c0_i32, %c0_i32_0 : i32, i32
  }
  func.func @transform_4(%arg0: i32) -> (i32, i32) {
    %c0_i32 = arith.constant 0 : i32
    %c0_i32_0 = arith.constant 0 : i32
    %c0_i32_1 = arith.constant 0 : i32
    return %c0_i32, %c0_i32_0 : i32, i32
  }
  func.func @transform_5(%arg0: i32) -> (i32, i32) {
    %c0_i32 = arith.constant 0 : i32
    %c0_i32_0 = arith.constant 0 : i32
    return %arg0, %c0_i32 : i32, i32
  }
}

</mosaic_0001>

<bundles_post_ra>
// kernel: tpu_custom_call.1
= control target key start
LH: loop header
LB: loop body
LE: loop exit
PB: predicated region body
PF: predicated region fallthrough
CT: control target
= control target key end

     0   :  { %10 = vsyncpa [#allocation4], 0  ;;  %s3976_s0 = inlined_call_operand.hbm [shape: f32[32,32], index: 0, kind: input, shape index: {}]   ;;  %s3977_s1 = inlined_call_operand.hbm [shape: f32[32,96], index: 1, kind: input, shape index: {}]   ;;  %s3978_s2 = inlined_call_operand.vmem [shape: f32[1,96], index: 2, kind: input, shape index: {}]   ;;  %s3979_s3 = inlined_call_operand.hbm [shape: f32[32,32], index: 3, kind: input, shape index: {}]   ;;  %s3980_s4 = inlined_call_operand.vmem [shape: f32[1,32], index: 4, kind: input, shape index: {}]   ;;  %s3981_s5 = inlined_call_operand.hbm [shape: f32[32,32], index: 5, kind: output, shape index: {}]  }
   0x1   :  { %11 = vsyncpa [#allocation7], 0 }
   0x2   :  { %12 = vsyncpa [#allocation5], 0  ;;  %s3542_s18 = smov [#allocation6]   ;;  %s3543_s20 = smov [#allocation3]  }
   0x3   :  { %s30_s19 = sshll.u32 %s3542_s18, 4  ;;  %s18_s21 = sshll.u32 %s3543_s20, 4  ;;  %s31_s19 = int_to_ptr.vmem [resolvable:$true] %s30_s19  ;;  %s3593_s21 = int_to_ptr.vmem [resolvable:$true] %s18_s21 }
   0x4   :  { %s3448_s24 = scalar_lea.hbm %s3977_s1, 512 }
   0x5   :  { %p3449_p0 = scmp.ne.s32.totalorder %s3977_s1, %s3448_s24  ;;  %p3452_p1 = scmp.lt.u32.totalorder %s3448_s24, %s3977_s1 }
   0x7   :  { %p3454_p2 = pnand %p3452_p1, %p3449_p0 }
   0x9   :  { %3457 = shalt.err (!%p3454_p2)
}
   0xa   :  { %s3458_s29 = scalar_lea.vmem %s31_s19, 512  ;;  %p3463_p4 = scmp.lt.s32.totalorder %s31_s19, %s31_s19 }
   0xb   :  { %p3459_p3 = scmp.ne.s32.totalorder %s31_s19, %s3458_s29  ;;  %p3464_p5 = scmp.lt.s32.totalorder %s3458_s29, %s3458_s29 }
   0xd   :  { %p3465_p6 = por %p3464_p5, %p3463_p4 }
   0xf   :  { %p3466_p7 = pnand %p3465_p6, %p3459_p3 }
  0x11   :  { %3469 = shalt.err (!%p3466_p7)
}
  0x12   :  { %s3544_s30 = smov 128   ;;  %s3545_s6 = smov 8  }
  0x13   :  { %36 = dma.hbm_to_vmem [thread:$0]  %s3977_s1, 512, %s31_s19, [#allocation7], %s3544_s30, %s3544_s30, %s3545_s6  }
  0x14   :  { %s3470_s11 = scalar_lea.hbm %s3976_s0, 512 }
  0x15   :  { %p3471_p8 = scmp.ne.s32.totalorder %s3976_s0, %s3470_s11  ;;  %p3474_p9 = scmp.lt.u32.totalorder %s3470_s11, %s3976_s0 }
  0x17   :  { %p3476_p10 = pnand %p3474_p9, %p3471_p8 }
  0x19   :  { %3479 = shalt.err (!%p3476_p10)
}
  0x1a   :  { %s3480_s16 = scalar_lea.vmem %s3593_s21, 512  ;;  %p3485_p12 = scmp.lt.s32.totalorder %s3593_s21, %s3593_s21 }
  0x1b   :  { %p3481_p11 = scmp.ne.s32.totalorder %s3593_s21, %s3480_s16  ;;  %p3486_p13 = scmp.lt.s32.totalorder %s3480_s16, %s3480_s16 }
  0x1d   :  { %p3487_p0 = por %p3486_p13, %p3485_p12 }
  0x1f   :  { %p3488_p1 = pnand %p3487_p0, %p3481_p11 }
  0x21   :  { %3491 = shalt.err (!%p3488_p1)
}
  0x22   :  { %24 = dma.hbm_to_vmem [thread:$0]  %s3976_s0, 512, %s3593_s21, [#allocation4], %s3544_s30, %s3544_s30, %s3545_s6  }
  0x23   :  { %s3546_s18 = smov [#allocation8]   ;;  %s3492_s23 = scalar_lea.hbm %s3979_s3, 512 }
  0x24   :  { %s44_s19 = sshll.u32 %s3546_s18, 4  ;;  %p3493_p2 = scmp.ne.s32.totalorder %s3979_s3, %s3492_s23  ;;  %s45_s19 = int_to_ptr.vmem [resolvable:$true] %s44_s19 }
  0x25   :  { %p3496_p3 = scmp.lt.u32.totalorder %s3492_s23, %s3979_s3 }
  0x27   :  { %p3498_p4 = pnand %p3496_p3, %p3493_p2 }
  0x29   :  { %3501 = shalt.err (!%p3498_p4)
}
  0x2a   :  { %s3502_s28 = scalar_lea.vmem %s45_s19, 512  ;;  %p3507_p6 = scmp.lt.s32.totalorder %s45_s19, %s45_s19 }
  0x2b   :  { %p3503_p5 = scmp.ne.s32.totalorder %s45_s19, %s3502_s28  ;;  %p3508_p7 = scmp.lt.s32.totalorder %s3502_s28, %s3502_s28 }
  0x2d   :  { %p3509_p8 = por %p3508_p7, %p3507_p6 }
  0x2f   :  { %p3510_p9 = pnand %p3509_p8, %p3503_p5 }
  0x31   :  { %3513 = shalt.err (!%p3510_p9)
}
  0x32   :  { %50 = dma.hbm_to_vmem [thread:$0]  %s3979_s3, 512, %s45_s19, [#allocation7], %s3544_s30, %s3544_s30, %s3545_s6  }
  0x33   :  { %3536 = dma.done.wait [#allocation4], 512  }
  0x34   :  { %3537 = vsyncadd [#allocation4], 4294966784 }
  0x35   :  { %3538 = dma.done.wait [#allocation7], 1024  }
  0x36   :  { %3539 = vsyncadd [#allocation7], 4294966272  ;;  %vm77_vm0 = vcmask 261120   ;;  %v66_v0 = vld [vmem:[#allocation6] sm:$0xff]  ;;  %v67_v1 = vld [vmem:[#allocation6 + $0x8] sm:$0xff]  ;;  %v3547_v10 = vmov 0.0  }
  0x37   :  { %v68_v2 = vld [vmem:[#allocation6 + $0x10] sm:$0xff]  ;;  %v3347_v3 = vpack.c.bf16 %v67_v1, %v66_v0  ;;  %v69_v4 = vld [vmem:[#allocation6 + $0x18] sm:$0xff]  ;;  %v62_v5 = vld [vmem:[#allocation3] sm:$0xff]  ;;  %3178 = vmatprep.subr.mxu1 %v3547_v10  ;;  %vm3548_vm1 = vmmov 0   ;;  %s3549_s7 = smov 96   ;;  %vm182_vm2 = vcmask 64512  }
  0x38   :  { %v3351_v6 = vpack.c.bf16 %v69_v4, %v68_v2  ;;  %3167 = vmatprep.mubr.msk.f32.mxu0 %vm77_vm0, %v62_v5  ;;  %v63_v7 = vld [vmem:[#allocation3 + $0x8] sm:$0xff]  ;;  %v64_v8 = vld [vmem:[#allocation3 + $0x10] sm:$0xff]  ;;  %v65_v9 = vld [vmem:[#allocation3 + $0x18] sm:$0xff]  ;;  %3180 = vmatprep.mubr.msk.f32.mxu1 %vm3548_vm1, %v3547_v10  ;;  %s3551_s8 = smov 88   ;;  %s3552_s9 = smov 120   ;;  %vm1520_vm3 = vcmask 130112  }
  0x39   :  { %3348 = vmatprep.subr.bf16.mxu0 %v3347_v3  ;;  %v3021_v11 = vld [vmem:[%s3978_s2] ss:$0 sm:$0xff]  ;;  %s3550_s2 = smov 64   ;;  %s3553_s10 = smov 56   ;;  %vm2201_vm4 = vcmask 195712   ;;  %vm2882_vm5 = vcmask 261312  }
  0x3a   :  { %3350 = vmatpush3.bf16.msra.mxu0 %v3347_v3  ;;  %s3554_s11 = smov 80   ;;  %s3555_s12 = smov 112  }
  0x3b   :  { %3352 = vmatprep.subr.bf16.mxu0 %v3351_v6  ;;  %s3556_s13 = smov 48   ;;  %s3557_s14 = smov 72  }
  0x3c   :  { %s3558_s15 = smov 104   ;;  %s3559_s16 = smov 40  }
  0x3d   :  { %s3560_s1 = smov 16   ;;  %s3561_s17 = smov 24  }
  0x3e   :  { %3354 = vmatpush3.bf16.msra.mxu0 %v3351_v6  ;;  %s3562_s20 = smov [#allocation9]  }
  0x3f   :  { %3173 = vmatprep.subr.mxu0 %v3547_v10  ;;  %s3008_s22 = sshll.u32 %s3562_s20, 4  ;;  %s3009_s22 = int_to_ptr.vmem [resolvable:$true] %s3008_s22 }
  0x40   :  { %p3519_p11 = scmp.lt.s32.totalorder %s3009_s22, %s3009_s22 }
  0x41   :  { %3168 = vmatmul.mubr.msk.f32.vlgmr.msra.gmra.mrb[0].mxu0 %vm77_vm0, %v63_v7 }
  0x42   :  { %3170 = vmatprep.mubr.msk.f32.mxu0 %vm77_vm0, %v64_v8 }
  0x45   :  { %3171 = vmatmul.mubr.msk.f32.gmra.mrb[2].mxu0 %vm77_vm0, %v65_v9 }
  0x46   :  { %3175 = vmatprep.mubr.msk.f32.mxu0 %vm3548_vm1, %v3547_v10 }
 0x114   :  { %v3169_v12 = vpop.f32.mrb[0].mxu0 }
 0x115   :  { %v156_v13 = vpop.f32.mrb[1].mxu0  ;;  %v3661_v17 = vadd.f32 %v3169_v12, %v3021_v11 }
 0x116   :  { %v3658_v14 = vadd.f32 %v3021_v11, %v156_v13 }
 0x117   :  { %v3681_v24 = vmul.f32 0.35355338, %v3661_v17 }
 0x118   :  { %v3172_v15 = vpop.f32.mrb[2].mxu0  ;;  %180 = vrot.lane.b32.xlu0 %v3658_v14, %s3549_s7  ;;  %v3672_v21 = vmul.f32 0.35355338, %v3658_v14 }
 0x119   :  { %v166_v16 = vpop.f32.mrb[3].mxu0  ;;  %v3665_v19 = vadd.f32 %v3172_v15, %v3021_v11 }
 0x11a   :  { %v3663_v18 = vadd.f32 %v3021_v11, %v166_v16 }
 0x11b   :  { %v3694_v27 = vmul.f32 0.35355338, %v3665_v19 }
 0x11c   :  { %337 = vrot.lane.b32.xlu1 %v3663_v18, %s3549_s7  ;;  %259 = vrot.lane.b32.xlu0 %v3661_v17, %s3549_s7  ;;  %v3691_v26 = vmul.f32 0.35355338, %v3663_v18 }
 0x120   :  { %415 = vrot.lane.b32.xlu1 %v3665_v19, %s3549_s7 }
 0x18a   :  { %v181_v20 = vpop.permute.xlu0 %180 }
 0x18b   :  { %3174 = vmatpush3.xpose.msk.msra.mxu0 %vm182_vm2, %v181_v20 }
 0x18c   :  { %3188 = vmatprep.subr.mxu0 %v3547_v10 }
 0x18e   :  { %v338_v22 = vpop.permute.xlu1 %337  ;;  %v260_v23 = vpop.permute.xlu0 %259  ;;  %3176 = vmatmul.mubr.msk.f32.vlgmr.msra.gmra.mrb[4].mxu0 %vm182_vm2, %v3672_v21 }
 0x18f   :  { %3179 = vmatpush3.xpose.msk.msra.mxu1 %vm182_vm2, %v260_v23  ;;  %3190 = vmatprep.mubr.msk.f32.mxu0 %vm3548_vm1, %v3547_v10 }
 0x190   :  { %3183 = vmatprep.subr.mxu1 %v3547_v10 }
 0x192   :  { %v416_v25 = vpop.permute.xlu1 %415  ;;  %3181 = vmatmul.mubr.msk.f32.vlgmr.msra.gmra.mrb[0].mxu1 %vm182_vm2, %v3681_v24 }
 0x193   :  { %3184 = vmatpush3.xpose.msk.msra.mxu1 %vm182_vm2, %v338_v22  ;;  %3189 = vmatpush3.xpose.msk.msra.mxu0 %vm182_vm2, %v416_v25 }
 0x194   :  { %3185 = vmatprep.mubr.msk.f32.mxu1 %vm3548_vm1, %v3547_v10  ;;  %3193 = vmatprep.subr.mxu1 %v3547_v10 }
 0x195   :  { %3198 = vmatprep.subr.mxu0 %v3547_v10 }
 0x196   :  { %3186 = vmatmul.mubr.msk.f32.vlgmr.msra.gmra.mrb[2].mxu1 %vm182_vm2, %v3691_v26  ;;  %3191 = vmatmul.mubr.msk.f32.vlgmr.msra.gmra.mrb[6].mxu0 %vm182_vm2, %v3694_v27 }
 0x197   :  { %3195 = vmatprep.mubr.msk.f32.mxu1 %vm3548_vm1, %v3547_v10  ;;  %3200 = vmatprep.mubr.msk.f32.mxu0 %vm3548_vm1, %v3547_v10 }
 0x261   :  { %v254_v28 = vpop.f32.mrb[4].mxu0 }
 0x262   :  { %v3177_v29 = vpop.f32.mrb[5].mxu0  ;;  %v492_v30 = vsel %vm182_vm2, %v254_v28, -inf }
 0x263   :  { %493 = vmax.xlane.f32.xlu0 %v492_v30 }
 0x265   :  { %v332_v31 = vpop.f32.mrb[0].mxu1 }
 0x266   :  { %v3182_v32 = vpop.f32.mrb[1].mxu1  ;;  %v495_v33 = vsel %vm182_vm2, %v332_v31, -inf }
 0x267   :  { %496 = vmax.xlane.f32.xlu1 %v495_v33 }
 0x269   :  { %v410_v34 = vpop.f32.mrb[2].mxu1  ;;  %v488_v35 = vpop.f32.mrb[6].mxu0 }
 0x26a   :  { %v3187_v36 = vpop.f32.mrb[3].mxu1  ;;  %v3192_v37 = vpop.f32.mrb[7].mxu0  ;;  %v498_v38 = vsel %vm182_vm2, %v410_v34, -inf  ;;  %v501_v39 = vsel %vm182_vm2, %v488_v35, -inf }
 0x26b   :  { %499 = vmax.xlane.f32.xlu0 %v498_v38 }
 0x26f   :  { %502 = vmax.xlane.f32.xlu0 %v501_v39 }
 0x278   :  { %536 = vrot.lane.b32.xlu1 %v3658_v14, %s3550_s2 }
 0x27c   :  { %688 = vrot.lane.b32.xlu1 %v3663_v18, %s3550_s2 }
 0x280   :  { %764 = vrot.lane.b32.xlu1 %v3665_v19, %s3550_s2 }
 0x284   :  { %924 = vrot.lane.b32.xlu1 %v3661_v17, %s3551_s8 }
 0x285   :  { %612 = vrot.lane.b32.xlu0 %v3661_v17, %s3550_s2 }
 0x289   :  { %846 = vrot.lane.b32.xlu0 %v3658_v14, %s3551_s8 }
 0x2f0   :  { %v494_v40 = vpop.xlane.xlu0 %493 }
 0x2f1   :  { %v504_v41 = vsub.f32 %v254_v28, %v494_v40 }
 0x2f3   :  { %v508_v42 = vmul.f32 1.442695, %v504_v41 }
 0x2f4   :  { %v497_v43 = vpop.xlane.xlu1 %496 }
 0x2f5   :  { %3384 = vpow2.f32 %v508_v42  ;;  %v505_v44 = vsub.f32 %v332_v31, %v497_v43 }
 0x2f7   :  { %v510_v45 = vmul.f32 1.442695, %v505_v44 }
 0x2f8   :  { %v537_v46 = vpop.permute.xlu1 %536  ;;  %v500_v47 = vpop.xlane.xlu0 %499 }
 0x2f9   :  { %3386 = vpow2.f32 %v510_v45  ;;  %v506_v48 = vsub.f32 %v410_v34, %v500_v47  ;;  %3194 = vmatpush3.msra.mxu1 %v537_v46 }
 0x2fa   :  { %3203 = vmatprep.subr.mxu1 %v3547_v10 }
 0x2fb   :  { %v512_v49 = vmul.f32 1.442695, %v506_v48 }
 0x2fc   :  { %v503_v50 = vpop.xlane.xlu0 %502  ;;  %v689_v62 = vpop.permute.xlu1 %688 }
 0x2fd   :  { %3388 = vpow2.f32 %v512_v49  ;;  %v507_v51 = vsub.f32 %v488_v35, %v503_v50 }
 0x2ff   :  { %v3385_v52 = vpop.eup %3384  ;;  %v514_v53 = vmul.f32 1.442695, %v507_v51 }
 0x300   :  { %v613_v54 = vpop.permute.xlu0 %612  ;;  %v516_v55 = vsel %vm182_vm2, %v3385_v52, 0.0  ;;  %v765_v63 = vpop.permute.xlu1 %764 }
 0x301   :  { %3390 = vpow2.f32 %v514_v53  ;;  %517 = vadd.xlane.f32.xlu1 %v516_v55  ;;  %3199 = vmatpush3.msra.mxu0 %v613_v54 }
 0x302   :  { %3208 = vmatprep.subr.mxu0 %v3547_v10 }
 0x303   :  { %v3387_v56 = vpop.eup %3386 }
 0x304   :  { %v519_v57 = vsel %vm182_vm2, %v3387_v56, 0.0  ;;  %v925_v0 = vpop.permute.xlu1 %924  ;;  %v847_v1 = vpop.permute.xlu0 %846 }
 0x305   :  { %520 = vadd.xlane.f32.xlu0 %v519_v57 }
 0x307   :  { %v3389_v58 = vpop.eup %3388 }
 0x308   :  { %v522_v59 = vsel %vm182_vm2, %v3389_v58, 0.0 }
 0x309   :  { %523 = vadd.xlane.f32.xlu1 %v522_v59 }
 0x30b   :  { %v3391_v60 = vpop.eup %3390 }
 0x30c   :  { %v525_v61 = vsel %vm182_vm2, %v3391_v60, 0.0 }
 0x30d   :  { %526 = vadd.xlane.f32.xlu0 %v525_v61 }
 0x31a   :  { %922 = vrot.lane.b32.xlu1 %v3681_v24, %s3552_s9 }
 0x31e   :  { %1080 = vrot.lane.b32.xlu1 %v3665_v19, %s3551_s8 }
 0x322   :  { %1078 = vrot.lane.b32.xlu1 %v3694_v27, %s3552_s9 }
 0x323   :  { %844 = vrot.lane.b32.xlu0 %v3672_v21, %s3552_s9 }
 0x327   :  { %1002 = vrot.lane.b32.xlu0 %v3663_v18, %s3551_s8 }
 0x32b   :  { %1000 = vrot.lane.b32.xlu0 %v3691_v26, %s3552_s9 }
 0x38e   :  { %v518_v2 = vpop.xlane.xlu1 %517 }
 0x38f   :  { %3392 = vrcp.f32 %v518_v2 }
 0x392   :  { %v521_v3 = vpop.xlane.xlu0 %520 }
 0x393   :  { %3394 = vrcp.f32 %v521_v3 }
 0x396   :  { %v524_v4 = vpop.xlane.xlu1 %523 }
 0x397   :  { %3396 = vrcp.f32 %v524_v4 }
 0x399   :  { %v3393_v5 = vpop.eup %3392 }
 0x39a   :  { %v532_v6 = vmul.f32 %v3393_v5, %v3385_v52  ;;  %v527_v7 = vpop.xlane.xlu0 %526  ;;  %v923_v15 = vpop.permute.xlu1 %922 }
 0x39b   :  { %3398 = vrcp.f32 %v527_v7 }
 0x39c   :  { %3196 = vmatmul.mubr.msk.f32.vlgmr.msra.gmra.mrb[4].mxu1 %vm182_vm2, %v532_v6 }
 0x39d   :  { %v3395_v8 = vpop.eup %3394  ;;  %3204 = vmatpush3.msra.mxu1 %v689_v62  ;;  %3205 = vmatprep.mubr.msk.f32.mxu1 %vm3548_vm1, %v3547_v10 }
 0x39e   :  { %v533_v9 = vmul.f32 %v3395_v8, %v3387_v56  ;;  %3213 = vmatprep.subr.mxu1 %v3547_v10  ;;  %v845_v11 = vpop.permute.xlu0 %844  ;;  %v1081_v23 = vpop.permute.xlu1 %1080 }
 0x3a0   :  { %3201 = vmatmul.mubr.msk.f32.vlgmr.msra.gmra.mrb[8].mxu0 %vm182_vm2, %v533_v9 }
 0x3a1   :  { %v3397_v12 = vpop.eup %3396  ;;  %3209 = vmatpush3.msra.mxu0 %v765_v63  ;;  %3210 = vmatprep.mubr.msk.f32.mxu0 %vm3548_vm1, %v3547_v10 }
 0x3a2   :  { %v534_v13 = vmul.f32 %v3397_v12, %v3389_v58  ;;  %3218 = vmatprep.subr.mxu0 %v3547_v10  ;;  %v1003_v20 = vpop.permute.xlu0 %1002  ;;  %v1079_v28 = vpop.permute.xlu1 %1078 }
 0x3a4   :  { %3206 = vmatmul.mubr.msk.f32.vlgmr.msra.gmra.mrb[6].mxu1 %vm182_vm2, %v534_v13 }
 0x3a5   :  { %v3399_v16 = vpop.eup %3398  ;;  %3214 = vmatpush3.xpose.msk.msra.mxu1 %vm182_vm2, %v847_v1  ;;  %3215 = vmatprep.mubr.msk.f32.mxu1 %vm3548_vm1, %v3547_v10 }
 0x3a6   :  { %v535_v22 = vmul.f32 %v3399_v16, %v3391_v60  ;;  %3223 = vmatprep.subr.mxu1 %v3547_v10  ;;  %v1001_v25 = vpop.permute.xlu0 %1000 }
 0x3a8   :  { %3211 = vmatmul.mubr.msk.f32.vlgmr.msra.gmra.mrb[10].mxu0 %vm182_vm2, %v535_v22  ;;  %3216 = vmatmul.mubr.msk.f32.vlgmr.msra.gmra.mrb[8].mxu1 %vm182_vm2, %v845_v11 }
 0x3a9   :  { %3219 = vmatpush3.xpose.msk.msra.mxu0 %vm182_vm2, %v925_v0  ;;  %3224 = vmatpush3.xpose.msk.msra.mxu1 %vm182_vm2, %v1003_v20 }
 0x3aa   :  { %3220 = vmatprep.mubr.msk.f32.mxu0 %vm3548_vm1, %v3547_v10  ;;  %3225 = vmatprep.mubr.msk.f32.mxu1 %vm3548_vm1, %v3547_v10 }
 0x3ab   :  { %3228 = vmatprep.subr.mxu0 %v3547_v10  ;;  %3233 = vmatprep.subr.mxu1 %v3547_v10 }
 0x3ac   :  { %3221 = vmatmul.mubr.msk.f32.vlgmr.msra.gmra.mrb[12].mxu0 %vm182_vm2, %v923_v15  ;;  %3226 = vmatmul.mubr.msk.f32.vlgmr.msra.gmra.mrb[10].mxu1 %vm182_vm2, %v1001_v25 }
 0x3ad   :  { %3229 = vmatpush3.xpose.msk.msra.mxu0 %vm182_vm2, %v1081_v23  ;;  %3230 = vmatprep.mubr.msk.f32.mxu0 %vm3548_vm1, %v3547_v10 }
 0x3ae   :  { %3238 = vmatprep.subr.mxu0 %v3547_v10  ;;  %3235 = vmatprep.mubr.msk.f32.mxu1 %vm3548_vm1, %v3547_v10 }
 0x3b0   :  { %3231 = vmatmul.mubr.msk.f32.vlgmr.msra.gmra.mrb[14].mxu0 %vm182_vm2, %v1079_v28 }
 0x3b1   :  { %3240 = vmatprep.mubr.msk.f32.mxu0 %vm3548_vm1, %v3547_v10 }
 0x46f   :  { %v608_v29 = vpop.f32.mrb[4].mxu1 }
 0x470   :  { %840 = vst.msk [vmem:[#allocation2] sm:$0xff] %vm182_vm2, %v608_v29  ;;  %v3197_v30 = vpop.f32.mrb[5].mxu1 }
 0x473   :  { %v684_v31 = vpop.f32.mrb[8].mxu0 }
 0x474   :  { %841 = vst.msk [vmem:[#allocation2 + $0x8] sm:$0xff] %vm182_vm2, %v684_v31  ;;  %v3202_v32 = vpop.f32.mrb[9].mxu0 }
 0x477   :  { %v760_v33 = vpop.f32.mrb[6].mxu1 }
 0x478   :  { %842 = vst.msk [vmem:[#allocation2 + $0x10] sm:$0xff] %vm182_vm2, %v760_v33  ;;  %v3207_v34 = vpop.f32.mrb[7].mxu1 }
 0x47b   :  { %v836_v35 = vpop.f32.mrb[10].mxu0  ;;  %v918_v36 = vpop.f32.mrb[8].mxu1 }
 0x47c   :  { %843 = vst.msk [vmem:[#allocation2 + $0x18] sm:$0xff] %vm182_vm2, %v836_v35  ;;  %v3212_v37 = vpop.f32.mrb[11].mxu0  ;;  %v3217_v38 = vpop.f32.mrb[9].mxu1  ;;  %v1156_v39 = vsel %vm182_vm2, %v918_v36, -inf }
 0x47d   :  { %1157 = vmax.xlane.f32.xlu0 %v1156_v39 }
 0x47f   :  { %v996_v40 = vpop.f32.mrb[12].mxu0  ;;  %v1074_v41 = vpop.f32.mrb[10].mxu1 }
 0x480   :  { %v3222_v42 = vpop.f32.mrb[13].mxu0  ;;  %v3227_v43 = vpop.f32.mrb[11].mxu1  ;;  %v1162_v44 = vsel %vm182_vm2, %v1074_v41, -inf  ;;  %v1159_v45 = vsel %vm182_vm2, %v996_v40, -inf }
 0x481   :  { %1163 = vmax.xlane.f32.xlu0 %v1162_v44  ;;  %1160 = vmax.xlane.f32.xlu1 %v1159_v45 }
 0x483   :  { %v1152_v46 = vpop.f32.mrb[14].mxu0 }
 0x484   :  { %v3232_v47 = vpop.f32.mrb[15].mxu0  ;;  %v1165_v48 = vsel %vm182_vm2, %v1152_v46, -inf }
 0x485   :  { %1166 = vmax.xlane.f32.xlu0 %v1165_v48 }
 0x492   :  { %1200 = vrot.lane.b32.xlu1 %v3658_v14, %s3553_s10 }
 0x496   :  { %1352 = vrot.lane.b32.xlu1 %v3663_v18, %s3553_s10 }
 0x49a   :  { %1428 = vrot.lane.b32.xlu1 %v3665_v19, %s3553_s10 }
 0x49b   :  { %1276 = vrot.lane.b32.xlu0 %v3661_v17, %s3553_s10 }
 0x49e   :  { %1605 = vrot.lane.b32.xlu1 %v3661_v17, %s3554_s11 }
 0x49f   :  { %1527 = vrot.lane.b32.xlu0 %v3658_v14, %s3554_s11 }
 0x50a   :  { %v1158_v49 = vpop.xlane.xlu0 %1157 }
 0x50b   :  { %v1168_v50 = vsub.f32 %v918_v36, %v1158_v49 }
 0x50d   :  { %v1172_v51 = vmul.f32 1.442695, %v1168_v50 }
 0x50e   :  { %v1164_v52 = vpop.xlane.xlu0 %1163  ;;  %v1161_v53 = vpop.xlane.xlu1 %1160 }
 0x50f   :  { %3400 = vpow2.f32 %v1172_v51  ;;  %v1169_v54 = vsub.f32 %v996_v40, %v1161_v53  ;;  %v1170_v3 = vsub.f32 %v1074_v41, %v1164_v52 }
 0x511   :  { %v1174_v55 = vmul.f32 1.442695, %v1169_v54  ;;  %v1176_v4 = vmul.f32 1.442695, %v1170_v3 }
 0x512   :  { %v1201_v56 = vpop.permute.xlu1 %1200  ;;  %v1167_v57 = vpop.xlane.xlu0 %1166 }
 0x513   :  { %v1171_v58 = vsub.f32 %v1152_v46, %v1167_v57  ;;  %3234 = vmatpush3.msra.mxu1 %v1201_v56  ;;  %3402 = vpow2.f32 %v1174_v55 }
 0x514   :  { %3243 = vmatprep.subr.mxu1 %v3547_v10 }
 0x515   :  { %v1178_v59 = vmul.f32 1.442695, %v1171_v58 }
 0x516   :  { %v1277_v60 = vpop.permute.xlu0 %1276  ;;  %v1353_v7 = vpop.permute.xlu1 %1352 }
 0x517   :  { %3404 = vpow2.f32 %v1178_v59  ;;  %3239 = vmatpush3.msra.mxu0 %v1277_v60 }
 0x518   :  { %3248 = vmatprep.subr.mxu0 %v3547_v10  ;;  %3406 = vpow2.f32 %v1176_v4 }
 0x519   :  { %v3401_v61 = vpop.eup %3400 }
 0x51a   :  { %v1180_v62 = vsel %vm182_vm2, %v3401_v61, 0.0  ;;  %v1429_v8 = vpop.permute.xlu1 %1428  ;;  %v1528_v12 = vpop.permute.xlu0 %1527 }
 0x51b   :  { %1181 = vadd.xlane.f32.xlu1 %v1180_v62 }
 0x51d   :  { %v3403_v63 = vpop.eup %3402 }
 0x51e   :  { %v1183_v0 = vsel %vm182_vm2, %v3403_v63, 0.0  ;;  %v1606_v9 = vpop.permute.xlu1 %1605 }
 0x51f   :  { %1184 = vadd.xlane.f32.xlu0 %v1183_v0 }
 0x521   :  { %v3405_v1 = vpop.eup %3404 }
 0x522   :  { %v1189_v2 = vsel %vm182_vm2, %v3405_v1, 0.0  ;;  %v3407_v5 = vpop.eup %3406 }
 0x523   :  { %1190 = vadd.xlane.f32.xlu0 %v1189_v2  ;;  %v1186_v6 = vsel %vm182_vm2, %v3407_v5, 0.0 }
 0x52c   :  { %1603 = vrot.lane.b32.xlu1 %v3681_v24, %s3555_s12 }
 0x539   :  { %1525 = vrot.lane.b32.xlu0 %v3672_v21, %s3555_s12 }
 0x53d   :  { %1683 = vrot.lane.b32.xlu0 %v3663_v18, %s3554_s11 }
 0x541   :  { %1681 = vrot.lane.b32.xlu0 %v3691_v26, %s3555_s12 }
 0x545   :  { %1957 = vrot.lane.b32.xlu0 %v3661_v17, %s3556_s13 }
 0x550   :  { %1187 = vadd.xlane.f32.xlu1 %v1186_v6 }
 0x561   :  { %1761 = vrot.lane.b32.xlu1 %v3665_v19, %s3554_s11 }
 0x565   :  { %1759 = vrot.lane.b32.xlu1 %v3694_v27, %s3555_s12 }
 0x569   :  { %1881 = vrot.lane.b32.xlu1 %v3658_v14, %s3556_s13 }
 0x56d   :  { %2033 = vrot.lane.b32.xlu1 %v3663_v18, %s3556_s13 }
 0x571   :  { %2109 = vrot.lane.b32.xlu1 %v3665_v19, %s3556_s13 }
 0x5a8   :  { %v1182_v11 = vpop.xlane.xlu1 %1181 }
 0x5a9   :  { %3408 = vrcp.f32 %v1182_v11 }
 0x5ac   :  { %v1185_v13 = vpop.xlane.xlu0 %1184  ;;  %v1604_v29 = vpop.permute.xlu1 %1603 }
 0x5ad   :  { %3410 = vrcp.f32 %v1185_v13 }
 0x5b0   :  { %v1191_v15 = vpop.xlane.xlu0 %1190 }
 0x5b1   :  { %3412 = vrcp.f32 %v1191_v15 }
 0x5b3   :  { %v3409_v16 = vpop.eup %3408 }
 0x5b4   :  { %v1196_v20 = vmul.f32 %v3409_v16, %v3401_v61  ;;  %v1526_v30 = vpop.permute.xlu0 %1525 }
 0x5b6   :  { %3236 = vmatmul.mubr.msk.f32.vlgmr.msra.gmra.mrb[12].mxu1 %vm182_vm2, %v1196_v20 }
 0x5b7   :  { %3244 = vmatpush3.msra.mxu1 %v1353_v7  ;;  %3245 = vmatprep.mubr.msk.f32.mxu1 %vm3548_vm1, %v3547_v10  ;;  %v3411_v22 = vpop.eup %3410 }
 0x5b8   :  { %3253 = vmatprep.subr.mxu1 %v3547_v10  ;;  %v1197_v23 = vmul.f32 %v3411_v22, %v3403_v63  ;;  %v1684_v31 = vpop.permute.xlu0 %1683 }
 0x5ba   :  { %3241 = vmatmul.mubr.msk.f32.vlgmr.msra.gmra.mrb[16].mxu0 %vm182_vm2, %v1197_v23 }
 0x5bb   :  { %v3413_v25 = vpop.eup %3412  ;;  %3249 = vmatpush3.msra.mxu0 %v1429_v8  ;;  %3250 = vmatprep.mubr.msk.f32.mxu0 %vm3548_vm1, %v3547_v10 }
 0x5bc   :  { %v1199_v28 = vmul.f32 %v3413_v25, %v3405_v1  ;;  %3258 = vmatprep.subr.mxu0 %v3547_v10  ;;  %v1682_v33 = vpop.permute.xlu0 %1681 }
 0x5be   :  { %3251 = vmatmul.mubr.msk.f32.vlgmr.msra.gmra.mrb[18].mxu0 %vm182_vm2, %v1199_v28 }
 0x5bf   :  { %3260 = vmatprep.mubr.msk.f32.mxu0 %vm3548_vm1, %v3547_v10 }
 0x5c0   :  { %v1958_v36 = vpop.permute.xlu0 %1957 }
 0x5c2   :  { %3259 = vmatpush3.xpose.msk.msra.mxu0 %vm182_vm2, %v1606_v9 }
 0x5c3   :  { %3268 = vmatprep.subr.mxu0 %v3547_v10 }
 0x5c5   :  { %3261 = vmatmul.mubr.msk.f32.vlgmr.msra.gmra.mrb[20].mxu0 %vm182_vm2, %v1604_v29 }
 0x5c6   :  { %3270 = vmatprep.mubr.msk.f32.mxu0 %vm3548_vm1, %v3547_v10 }
 0x5dd   :  { %v1188_v32 = vpop.xlane.xlu1 %1187 }
 0x5de   :  { %3414 = vrcp.f32 %v1188_v32 }
 0x5e1   :  { %v1762_v34 = vpop.permute.xlu1 %1761 }
 0x5e2   :  { %3269 = vmatpush3.xpose.msk.msra.mxu0 %vm182_vm2, %v1762_v34 }
 0x5e3   :  { %3278 = vmatprep.subr.mxu0 %v3547_v10 }
 0x5e5   :  { %v1760_v35 = vpop.permute.xlu1 %1759 }
 0x5e6   :  { %3271 = vmatmul.mubr.msk.f32.vlgmr.msra.gmra.mrb[22].mxu0 %vm182_vm2, %v1760_v35 }
 0x5e7   :  { %3279 = vmatpush3.msra.mxu0 %v1958_v36  ;;  %3280 = vmatprep.mubr.msk.f32.mxu0 %vm3548_vm1, %v3547_v10 }
 0x5e8   :  { %v3415_v37 = vpop.eup %3414  ;;  %3288 = vmatprep.subr.mxu0 %v3547_v10 }
 0x5e9   :  { %v1198_v38 = vmul.f32 %v3415_v37, %v3407_v5  ;;  %v1882_v39 = vpop.permute.xlu1 %1881 }
 0x5eb   :  { %3246 = vmatmul.mubr.msk.f32.vlgmr.msra.gmra.mrb[14].mxu1 %vm182_vm2, %v1198_v38 }
 0x5ec   :  { %3254 = vmatpush3.xpose.msk.msra.mxu1 %vm182_vm2, %v1528_v12  ;;  %3255 = vmatprep.mubr.msk.f32.mxu1 %vm3548_vm1, %v3547_v10 }
 0x5ed   :  { %3263 = vmatprep.subr.mxu1 %v3547_v10 }
 0x5ef   :  { %3256 = vmatmul.mubr.msk.f32.vlgmr.msra.gmra.mrb[16].mxu1 %vm182_vm2, %v1526_v30 }
 0x5f0   :  { %3264 = vmatpush3.xpose.msk.msra.mxu1 %vm182_vm2, %v1684_v31  ;;  %3265 = vmatprep.mubr.msk.f32.mxu1 %vm3548_vm1, %v3547_v10 }
 0x5f1   :  { %3273 = vmatprep.subr.mxu1 %v3547_v10 }
 0x5f3   :  { %3266 = vmatmul.mubr.msk.f32.vlgmr.msra.gmra.mrb[18].mxu1 %vm182_vm2, %v1682_v33 }
 0x5f4   :  { %3274 = vmatpush3.msra.mxu1 %v1882_v39  ;;  %3275 = vmatprep.mubr.msk.f32.mxu1 %vm3548_vm1, %v3547_v10 }
 0x5f5   :  { %3283 = vmatprep.subr.mxu1 %v3547_v10 }
 0x689   :  { %v3836_v40 = vpop.f32.mrb[12].mxu1 }
 0x68a   :  { %v3237_v41 = vpop.f32.mrb[13].mxu1 }
 0x68d   :  { %v3838_v42 = vpop.f32.mrb[16].mxu0 }
 0x68e   :  { %v3242_v43 = vpop.f32.mrb[17].mxu0 }
 0x691   :  { %v3840_v44 = vpop.f32.mrb[18].mxu0 }
 0x692   :  { %v3252_v45 = vpop.f32.mrb[19].mxu0 }
 0x698   :  { %v1677_v46 = vpop.f32.mrb[20].mxu0 }
 0x699   :  { %v3262_v47 = vpop.f32.mrb[21].mxu0  ;;  %v1840_v48 = vsel %vm182_vm2, %v1677_v46, -inf }
 0x69a   :  { %1841 = vmax.xlane.f32.xlu1 %v1840_v48 }
 0x6ab   :  { %2286 = vrot.lane.b32.xlu1 %v3661_v17, %s3557_s14 }
 0x6af   :  { %2284 = vrot.lane.b32.xlu1 %v3681_v24, %s3558_s15  ;;  %v2034_v24 = vpop.permute.xlu1 %2033 }
 0x6b3   :  { %v2110_v60 = vpop.permute.xlu1 %2109 }
 0x6b9   :  { %v1833_v49 = vpop.f32.mrb[22].mxu0 }
 0x6ba   :  { %v3272_v50 = vpop.f32.mrb[23].mxu0  ;;  %v1846_v58 = vsel %vm182_vm2, %v1833_v49, -inf }
 0x6be   :  { %v3847_v51 = vpop.f32.mrb[14].mxu1 }
 0x6bf   :  { %v3247_v52 = vpop.f32.mrb[15].mxu1 }
 0x6c2   :  { %v1599_v53 = vpop.f32.mrb[16].mxu1 }
 0x6c3   :  { %v3257_v54 = vpop.f32.mrb[17].mxu1  ;;  %v1837_v55 = vsel %vm182_vm2, %v1599_v53, -inf }
 0x6c4   :  { %1838 = vmax.xlane.f32.xlu0 %v1837_v55 }
 0x6c6   :  { %v1755_v56 = vpop.f32.mrb[18].mxu1 }
 0x6c7   :  { %v3267_v57 = vpop.f32.mrb[19].mxu1  ;;  %v1843_v59 = vsel %vm182_vm2, %v1755_v56, -inf }
 0x6c8   :  { %1847 = vmax.xlane.f32.xlu0 %v1846_v58 }
 0x6cc   :  { %1844 = vmax.xlane.f32.xlu0 %v1843_v59 }
 0x6e2   :  { %2208 = vrot.lane.b32.xlu0 %v3658_v14, %s3557_s14 }
 0x727   :  { %v1842_v61 = vpop.xlane.xlu1 %1841 }
 0x728   :  { %v1850_v62 = vsub.f32 %v1677_v46, %v1842_v61 }
 0x72a   :  { %v1855_v63 = vmul.f32 1.442695, %v1850_v62 }
 0x72c   :  { %3416 = vpow2.f32 %v1855_v63 }
 0x736   :  { %v3417_v0 = vpop.eup %3416 }
 0x737   :  { %v1864_v1 = vsel %vm182_vm2, %v3417_v0, 0.0 }
 0x738   :  { %1865 = vadd.xlane.f32.xlu0 %v1864_v1 }
 0x74e   :  { %2206 = vrot.lane.b32.xlu0 %v3672_v21, %s3558_s15 }
 0x751   :  { %v1839_v2 = vpop.xlane.xlu0 %1838 }
 0x752   :  { %v1849_v3 = vsub.f32 %v1599_v53, %v1839_v2 }
 0x754   :  { %v1853_v4 = vmul.f32 1.442695, %v1849_v3 }
 0x755   :  { %v1848_v5 = vpop.xlane.xlu0 %1847 }
 0x756   :  { %3418 = vpow2.f32 %v1853_v4  ;;  %v1852_v6 = vsub.f32 %v1833_v49, %v1848_v5 }
 0x758   :  { %v1859_v7 = vmul.f32 1.442695, %v1852_v6 }
 0x759   :  { %v1845_v21 = vpop.xlane.xlu0 %1844 }
 0x75a   :  { %3420 = vpow2.f32 %v1859_v7  ;;  %v1851_v13 = vsub.f32 %v1755_v56, %v1845_v21 }
 0x75c   :  { %v1857_v15 = vmul.f32 1.442695, %v1851_v13 }
 0x75d   :  { %v2209_v22 = vpop.permute.xlu0 %2208 }
 0x75e   :  { %3422 = vpow2.f32 %v1857_v15 }
 0x760   :  { %v3419_v8 = vpop.eup %3418 }
 0x761   :  { %v1861_v9 = vsel %vm182_vm2, %v3419_v8, 0.0 }
 0x762   :  { %1862 = vadd.xlane.f32.xlu1 %v1861_v9 }
 0x764   :  { %v3421_v11 = vpop.eup %3420 }
 0x765   :  { %v1870_v12 = vsel %vm182_vm2, %v3421_v11, 0.0 }
 0x768   :  { %v3423_v16 = vpop.eup %3422 }
 0x769   :  { %v1867_v20 = vsel %vm182_vm2, %v3423_v16, 0.0 }
 0x76d   :  { %1871 = vadd.xlane.f32.xlu0 %v1870_v12 }
 0x773   :  { %2442 = vrot.lane.b32.xlu1 %v3665_v19, %s3557_s14 }
 0x783   :  { %2364 = vrot.lane.b32.xlu0 %v3663_v18, %s3557_s14 }
 0x787   :  { %2362 = vrot.lane.b32.xlu0 %v3691_v26, %s3558_s15  ;;  %v2287_v26 = vpop.permute.xlu1 %2286 }
 0x78b   :  { %v2285_v29 = vpop.permute.xlu1 %2284 }
 0x797   :  { %1868 = vadd.xlane.f32.xlu1 %v1867_v20 }
 0x7a8   :  { %2440 = vrot.lane.b32.xlu1 %v3694_v27, %s3558_s15 }
 0x7c5   :  { %v1866_v23 = vpop.xlane.xlu0 %1865 }
 0x7c6   :  { %3424 = vrcp.f32 %v1866_v23 }
 0x7c9   :  { %v2207_v31 = vpop.permute.xlu0 %2206 }
 0x7d0   :  { %v3425_v25 = vpop.eup %3424 }
 0x7d1   :  { %v1878_v28 = vmul.f32 %v3425_v25, %v3417_v0 }
 0x7d3   :  { %3281 = vmatmul.mubr.msk.f32.vlgmr.msra.gmra.mrb[24].mxu0 %vm182_vm2, %v1878_v28 }
 0x7d4   :  { %3289 = vmatpush3.msra.mxu0 %v2110_v60  ;;  %3290 = vmatprep.mubr.msk.f32.mxu0 %vm3548_vm1, %v3547_v10 }
 0x7d5   :  { %3298 = vmatprep.subr.mxu0 %v3547_v10 }
 0x7ef   :  { %v1863_v30 = vpop.xlane.xlu1 %1862 }
 0x7f0   :  { %3426 = vrcp.f32 %v1863_v30 }
 0x7f3   :  { %v2443_v36 = vpop.permute.xlu1 %2442 }
 0x7fa   :  { %v3427_v32 = vpop.eup %3426  ;;  %v1872_v33 = vpop.xlane.xlu0 %1871 }
 0x7fb   :  { %v1877_v27 = vmul.f32 %v3427_v32, %v3419_v8  ;;  %3428 = vrcp.f32 %v1872_v33 }
 0x7fd   :  { %3276 = vmatmul.mubr.msk.f32.vlgmr.msra.gmra.mrb[20].mxu1 %vm182_vm2, %v1877_v27 }
 0x7fe   :  { %3284 = vmatpush3.msra.mxu1 %v2034_v24  ;;  %3285 = vmatprep.mubr.msk.f32.mxu1 %vm3548_vm1, %v3547_v10  ;;  %v2365_v43 = vpop.permute.xlu0 %2364 }
 0x7ff   :  { %3293 = vmatprep.subr.mxu1 %v3547_v10 }
 0x802   :  { %v2363_v45 = vpop.permute.xlu0 %2362 }
 0x805   :  { %v3429_v34 = vpop.eup %3428 }
 0x806   :  { %v1880_v35 = vmul.f32 %v3429_v34, %v3421_v11 }
 0x808   :  { %3291 = vmatmul.mubr.msk.f32.vlgmr.msra.gmra.mrb[26].mxu0 %vm182_vm2, %v1880_v35 }
 0x809   :  { %3299 = vmatpush3.xpose.msk.msra.mxu0 %vm182_vm2, %v2287_v26  ;;  %3300 = vmatprep.mubr.msk.f32.mxu0 %vm3548_vm1, %v3547_v10 }
 0x80a   :  { %3308 = vmatprep.subr.mxu0 %v3547_v10 }
 0x80c   :  { %3301 = vmatmul.mubr.msk.f32.vlgmr.msra.gmra.mrb[28].mxu0 %vm182_vm2, %v2285_v29 }
 0x80d   :  { %3309 = vmatpush3.xpose.msk.msra.mxu0 %vm182_vm2, %v2443_v36  ;;  %3310 = vmatprep.mubr.msk.f32.mxu0 %vm3548_vm1, %v3547_v10 }
 0x80e   :  { %3318 = vmatprep.subr.mxu0 %v3547_v10 }
 0x824   :  { %v1869_v37 = vpop.xlane.xlu1 %1868 }
 0x825   :  { %3430 = vrcp.f32 %v1869_v37 }
 0x828   :  { %v2441_v38 = vpop.permute.xlu1 %2440 }
 0x829   :  { %3311 = vmatmul.mubr.msk.f32.vlgmr.msra.gmra.mrb[30].mxu0 %vm182_vm2, %v2441_v38 }
 0x82a   :  { %3320 = vmatprep.mubr.msk.f32.mxu0 %vm3548_vm1, %v3547_v10 }
 0x82f   :  { %v3431_v39 = vpop.eup %3430 }
 0x830   :  { %v1879_v41 = vmul.f32 %v3431_v39, %v3423_v16 }
 0x832   :  { %3286 = vmatmul.mubr.msk.f32.vlgmr.msra.gmra.mrb[22].mxu1 %vm182_vm2, %v1879_v41 }
 0x833   :  { %3294 = vmatpush3.xpose.msk.msra.mxu1 %vm182_vm2, %v2209_v22  ;;  %3295 = vmatprep.mubr.msk.f32.mxu1 %vm3548_vm1, %v3547_v10 }
 0x834   :  { %3303 = vmatprep.subr.mxu1 %v3547_v10 }
 0x836   :  { %3296 = vmatmul.mubr.msk.f32.vlgmr.msra.gmra.mrb[24].mxu1 %vm182_vm2, %v2207_v31 }
 0x837   :  { %3304 = vmatpush3.xpose.msk.msra.mxu1 %vm182_vm2, %v2365_v43  ;;  %3305 = vmatprep.mubr.msk.f32.mxu1 %vm3548_vm1, %v3547_v10 }
 0x838   :  { %3313 = vmatprep.subr.mxu1 %v3547_v10 }
 0x83a   :  { %3306 = vmatmul.mubr.msk.f32.vlgmr.msra.gmra.mrb[26].mxu1 %vm182_vm2, %v2363_v45 }
 0x83b   :  { %3315 = vmatprep.mubr.msk.f32.mxu1 %vm3548_vm1, %v3547_v10 }
 0x8a6   :  { %v3902_v46 = vpop.f32.mrb[24].mxu0 }
 0x8a7   :  { %v3282_v47 = vpop.f32.mrb[25].mxu0 }
 0x8a8   :  { %v2892_v47 = vld [vmem:[#allocation8 + $0x8] sm:$0xff] }
 0x8d0   :  { %v1953_v48 = vpop.f32.mrb[20].mxu1 }
 0x8d1   :  { %v3277_v49 = vpop.f32.mrb[21].mxu1 }
 0x8db   :  { %v3904_v50 = vpop.f32.mrb[26].mxu0 }
 0x8dc   :  { %v3292_v52 = vpop.f32.mrb[27].mxu0 }
 0x8df   :  { %v2358_v53 = vpop.f32.mrb[28].mxu0 }
 0x8e0   :  { %v3302_v54 = vpop.f32.mrb[29].mxu0  ;;  %v2521_v55 = vsel %vm182_vm2, %v2358_v53, -inf }
 0x8e1   :  { %2522 = vmax.xlane.f32.xlu1 %v2521_v55 }
 0x8f2   :  { %2562 = vrot.lane.b32.xlu1 %v3658_v14, %s3559_s16 }
 0x8fc   :  { %v2514_v56 = vpop.f32.mrb[30].mxu0 }
 0x8fd   :  { %v3312_v57 = vpop.f32.mrb[31].mxu0  ;;  %v2527_v1 = vsel %vm182_vm2, %v2514_v56, -inf }
 0x905   :  { %v2105_v58 = vpop.f32.mrb[22].mxu1 }
 0x906   :  { %v3287_v59 = vpop.f32.mrb[23].mxu1 }
 0x909   :  { %v2280_v24 = vpop.f32.mrb[24].mxu1 }
 0x90a   :  { %v3297_v60 = vpop.f32.mrb[25].mxu1  ;;  %v2518_v61 = vsel %vm182_vm2, %v2280_v24, -inf }
 0x90b   :  { %2519 = vmax.xlane.f32.xlu0 %v2518_v61 }
 0x90d   :  { %v2436_v62 = vpop.f32.mrb[26].mxu1 }
 0x90e   :  { %v3307_v63 = vpop.f32.mrb[27].mxu1  ;;  %v2524_v0 = vsel %vm182_vm2, %v2436_v62, -inf }
 0x90f   :  { %2525 = vmax.xlane.f32.xlu0 %v2524_v0 }
 0x913   :  { %2528 = vmax.xlane.f32.xlu0 %v2527_v1 }
 0x96e   :  { %v2523_v2 = vpop.xlane.xlu1 %2522 }
 0x96f   :  { %v2531_v3 = vsub.f32 %v2358_v53, %v2523_v2 }
 0x971   :  { %v2536_v14 = vmul.f32 1.442695, %v2531_v3 }
 0x972   :  { %v2563_v4 = vpop.permute.xlu1 %2562 }
 0x973   :  { %3432 = vpow2.f32 %v2536_v14  ;;  %3314 = vmatpush3.msra.mxu1 %v2563_v4  ;;  %v3074_v14 = vld [vmem:[%s3980_s4] ss:$0 sm:$0xff]  ;;  %s3514_s4 = scalar_lea.vmem %s3009_s22, 512 }
 0x974   :  { %3323 = vmatprep.subr.mxu1 %v3547_v10  ;;  %p3515_p10 = scmp.ne.s32.totalorder %s3009_s22, %s3514_s4  ;;  %p3520_p12 = scmp.lt.s32.totalorder %s3514_s4, %s3514_s4 }
 0x976   :  { %p3521_p13 = por %p3520_p12, %p3519_p11 }
 0x978   :  { %p3522_p0 = pnand %p3521_p13, %p3515_p10 }
 0x97d   :  { %v3433_v5 = vpop.eup %3432 }
 0x97e   :  { %v2545_v6 = vsel %vm182_vm2, %v3433_v5, 0.0 }
 0x97f   :  { %2546 = vadd.xlane.f32.xlu0 %v2545_v6 }
 0x998   :  { %v2520_v7 = vpop.xlane.xlu0 %2519 }
 0x999   :  { %v2530_v8 = vsub.f32 %v2280_v24, %v2520_v7 }
 0x99b   :  { %v2534_v9 = vmul.f32 1.442695, %v2530_v8 }
 0x99c   :  { %v2526_v11 = vpop.xlane.xlu0 %2525 }
 0x99d   :  { %3434 = vpow2.f32 %v2534_v9  ;;  %v2532_v23 = vsub.f32 %v2436_v62, %v2526_v11 }
 0x99f   :  { %v2538_v25 = vmul.f32 1.442695, %v2532_v23 }
 0x9a0   :  { %v2529_v12 = vpop.xlane.xlu0 %2528 }
 0x9a1   :  { %v2533_v21 = vsub.f32 %v2514_v56, %v2529_v12 }
 0x9a3   :  { %v2540_v13 = vmul.f32 1.442695, %v2533_v21 }
 0x9a5   :  { %3436 = vpow2.f32 %v2540_v13 }
 0x9a6   :  { %3438 = vpow2.f32 %v2538_v25 }
 0x9a7   :  { %v3435_v15 = vpop.eup %3434 }
 0x9a8   :  { %v2542_v16 = vsel %vm182_vm2, %v3435_v15, 0.0 }
 0x9a9   :  { %2543 = vadd.xlane.f32.xlu1 %v2542_v16 }
 0x9af   :  { %v3437_v20 = vpop.eup %3436 }
 0x9b0   :  { %v2551_v22 = vsel %vm182_vm2, %v3437_v20, 0.0  ;;  %v3439_v28 = vpop.eup %3438 }
 0x9b1   :  { %2552 = vadd.xlane.f32.xlu0 %v2551_v22  ;;  %v2548_v26 = vsel %vm182_vm2, %v3439_v28, 0.0 }
 0x9ba   :  { %2714 = vrot.lane.b32.xlu1 %v3663_v18, %s3559_s16 }
 0x9c7   :  { %2638 = vrot.lane.b32.xlu0 %v3661_v17, %s3559_s16 }
 0x9cb   :  { %1508 = vrot.lane.b32.xlu0 %v3836_v40, %s3545_s6 }
 0x9cf   :  { %2189 = vrot.lane.b32.xlu0 %v1953_v48, %s3560_s1  ;;  %v2893_v48 = vld [vmem:[#allocation8 + $0x10] sm:$0xff] }
 0x9d3   :  { %1512 = vrot.lane.b32.xlu0 %v3847_v51, %s3545_s6 }
 0x9d7   :  { %2193 = vrot.lane.b32.xlu0 %v2105_v58, %s3560_s1 }
 0x9de   :  { %2549 = vadd.xlane.f32.xlu1 %v2548_v26 }
 0x9ef   :  { %2790 = vrot.lane.b32.xlu1 %v3665_v19, %s3559_s16 }
 0x9f3   :  { %1510 = vrot.lane.b32.xlu1 %v3838_v42, %s3545_s6 }
 0x9f7   :  { %2191 = vrot.lane.b32.xlu1 %v3902_v46, %s3560_s1  ;;  %v2891_v46 = vld [vmem:[#allocation8] sm:$0xff] }
 0x9f8   :  { %v3355_v49 = vpack.c.bf16 %v2892_v47, %v2891_v46 }
 0x9fb   :  { %1514 = vrot.lane.b32.xlu1 %v3840_v44, %s3545_s6 }
 0x9ff   :  { %2195 = vrot.lane.b32.xlu1 %v3904_v50, %s3560_s1  ;;  %v2894_v50 = vld [vmem:[#allocation8 + $0x18] sm:$0xff] }
 0xa00   :  { %v3359_v52 = vpack.c.bf16 %v2894_v50, %v2893_v48 }
 0xa0c   :  { %v2547_v17 = vpop.xlane.xlu0 %2546 }
 0xa0d   :  { %3440 = vrcp.f32 %v2547_v17 }
 0xa17   :  { %v3441_v51 = vpop.eup %3440 }
 0xa18   :  { %v2559_v30 = vmul.f32 %v3441_v51, %v3433_v5 }
 0xa36   :  { %v2544_v18 = vpop.xlane.xlu1 %2543 }
 0xa37   :  { %3442 = vrcp.f32 %v2544_v18 }
 0xa3a   :  { %v2715_v32 = vpop.permute.xlu1 %2714 }
 0xa3e   :  { %v2553_v40 = vpop.xlane.xlu0 %2552 }
 0xa3f   :  { %3444 = vrcp.f32 %v2553_v40 }
 0xa41   :  { %v3443_v29 = vpop.eup %3442 }
 0xa42   :  { %v2558_v31 = vmul.f32 %v3443_v29, %v3435_v15  ;;  %v2639_v19 = vpop.permute.xlu0 %2638 }
 0xa43   :  { %3319 = vmatpush3.msra.mxu0 %v2639_v19 }
 0xa44   :  { %3316 = vmatmul.mubr.msk.f32.vlgmr.msra.gmra.mrb[28].mxu1 %vm182_vm2, %v2558_v31  ;;  %3321 = vmatmul.mubr.msk.f32.vlgmr.msra.gmra.mrb[32].mxu0 %vm182_vm2, %v2559_v30 }
 0xa45   :  { %3324 = vmatpush3.msra.mxu1 %v2715_v32  ;;  %3328 = vmatprep.subr.mxu0 %v3547_v10 }
 0xa46   :  { %v1509_v42 = vpop.permute.xlu0 %1508  ;;  %3330 = vmatprep.mubr.msk.f32.mxu0 %vm3548_vm1, %v3547_v10  ;;  %3325 = vmatprep.mubr.msk.f32.mxu1 %vm3548_vm1, %v3547_v10 }
 0xa47   :  { %1521 = vst.msk [vmem:[#allocation2] sm:$0xff] %vm1520_vm3, %v1509_v42  ;;  %3356 = vmatprep.subr.bf16.mxu1 %v3355_v49 }
 0xa49   :  { %v3445_v35 = vpop.eup %3444 }
 0xa4a   :  { %v2190_v44 = vpop.permute.xlu0 %2189  ;;  %v2561_v36 = vmul.f32 %v3445_v35, %v3437_v20 }
 0xa4b   :  { %2202 = vst.msk [vmem:[#allocation2] sm:$0xff] %vm2201_vm4, %v2190_v44 }
 0xa4e   :  { %v1513_v27 = vpop.permute.xlu0 %1512 }
 0xa4f   :  { %1523 = vst.msk [vmem:[#allocation2 + $0x10] sm:$0xff] %vm1520_vm3, %v1513_v27 }
 0xa52   :  { %v2194_v33 = vpop.permute.xlu0 %2193 }
 0xa53   :  { %2204 = vst.msk [vmem:[#allocation2 + $0x10] sm:$0xff] %vm2201_vm4, %v2194_v33 }
 0xa6b   :  { %v2550_v34 = vpop.xlane.xlu1 %2549 }
 0xa6c   :  { %3446 = vrcp.f32 %v2550_v34 }
 0xa6f   :  { %v2791_v37 = vpop.permute.xlu1 %2790 }
 0xa70   :  { %3329 = vmatpush3.msra.mxu0 %v2791_v37 }
 0xa71   :  { %3331 = vmatmul.mubr.msk.f32.vlgmr.msra.gmra.mrb[34].mxu0 %vm182_vm2, %v2561_v36 }
 0xa73   :  { %v1511_v10 = vpop.permute.xlu1 %1510 }
 0xa74   :  { %1522 = vst.msk [vmem:[#allocation2 + $0x8] sm:$0xff] %vm1520_vm3, %v1511_v10 }
 0xa76   :  { %v3447_v38 = vpop.eup %3446 }
 0xa77   :  { %v2560_v39 = vmul.f32 %v3447_v38, %v3439_v28  ;;  %v2192_v41 = vpop.permute.xlu1 %2191 }
 0xa78   :  { %2203 = vst.msk [vmem:[#allocation2 + $0x8] sm:$0xff] %vm2201_vm4, %v2192_v41 }
 0xa79   :  { %3326 = vmatmul.mubr.msk.f32.vlgmr.msra.gmra.mrb[30].mxu1 %vm182_vm2, %v2560_v39 }
 0xa7a   :  { %3358 = vmatpush3.bf16.msra.mxu1 %v3355_v49 }
 0xa7b   :  { %v1515_v43 = vpop.permute.xlu1 %1514  ;;  %3360 = vmatprep.subr.bf16.mxu1 %v3359_v52 }
 0xa7c   :  { %1524 = vst.msk [vmem:[#allocation2 + $0x18] sm:$0xff] %vm1520_vm3, %v1515_v43 }
 0xa7e   :  { %3362 = vmatpush3.bf16.msra.mxu1 %v3359_v52 }
 0xa7f   :  { %v2196_v45 = vpop.permute.xlu1 %2195 }
 0xa80   :  { %2205 = vst.msk [vmem:[#allocation2 + $0x18] sm:$0xff] %vm2201_vm4, %v2196_v45 }
 0xb17   :  { %v2634_v53 = vpop.f32.mrb[28].mxu1  ;;  %v2710_v54 = vpop.f32.mrb[32].mxu0 }
 0xb18   :  { %v3317_v55 = vpop.f32.mrb[29].mxu1  ;;  %2870 = vrot.lane.b32.xlu0 %v2634_v53, %s3561_s17  ;;  %2872 = vrot.lane.b32.xlu1 %v2710_v54, %s3561_s17  ;;  %v3322_v56 = vpop.f32.mrb[33].mxu0 }
 0xb44   :  { %v2862_v57 = vpop.f32.mrb[34].mxu0 }
 0xb45   :  { %2876 = vrot.lane.b32.xlu1 %v2862_v57, %s3561_s17  ;;  %v3332_v58 = vpop.f32.mrb[35].mxu0 }
 0xb4c   :  { %v2786_v59 = vpop.f32.mrb[30].mxu1 }
 0xb4d   :  { %v3327_v24 = vpop.f32.mrb[31].mxu1  ;;  %2874 = vrot.lane.b32.xlu0 %v2786_v59, %s3561_s17 }
 0xb8a   :  { %v2871_v60 = vpop.permute.xlu0 %2870  ;;  %v2873_v61 = vpop.permute.xlu1 %2872 }
 0xb8b   :  { %2883 = vst.msk [vmem:[#allocation2] sm:$0xff] %vm2882_vm5, %v2871_v60  ;;  %2884 = vst.msk [vmem:[#allocation2 + $0x8] sm:$0xff] %vm2882_vm5, %v2873_v61 }
 0xb92   :  { %v2887_v62 = vld [vmem:[#allocation2] sm:$0xff]  ;;  %v2888_v63 = vld [vmem:[#allocation2 + $0x8] sm:$0xff] }
 0xb93   :  { %3341 = vmatprep.mubr.msk.f32.mxu1 %vm77_vm0, %v2887_v62 }
 0xb94   :  { %3342 = vmatmul.mubr.msk.f32.vlgmr.msra.gmra.mrb[32].mxu1 %vm77_vm0, %v2888_v63 }
 0xbb7   :  { %v2877_v0 = vpop.permute.xlu1 %2876 }
 0xbb8   :  { %2886 = vst.msk [vmem:[#allocation2 + $0x18] sm:$0xff] %vm2882_vm5, %v2877_v0 }
 0xbbf   :  { %v2875_v1 = vpop.permute.xlu0 %2874  ;;  %v2890_v3 = vld [vmem:[#allocation2 + $0x18] sm:$0xff] }
 0xbc0   :  { %2885 = vst.msk [vmem:[#allocation2 + $0x10] sm:$0xff] %vm2882_vm5, %v2875_v1 }
 0xbc7   :  { %v2889_v2 = vld [vmem:[#allocation2 + $0x10] sm:$0xff] }
 0xbc8   :  { %3344 = vmatprep.mubr.msk.f32.mxu1 %vm77_vm0, %v2889_v2 }
 0xbc9   :  { %3345 = vmatmul.mubr.msk.f32.gmra.mrb[34].mxu1 %vm77_vm0, %v2890_v3 }
 0xc67   :  { %v3343_v4 = vpop.f32.mrb[32].mxu1 }
 0xc68   :  { %v2986_v5 = vadd.f32 %v3343_v4, %v3074_v14  ;;  %v2980_v6 = vpop.f32.mrb[33].mxu1 }
 0xc69   :  { %v2981_v7 = vadd.f32 %v3074_v14, %v2980_v6 }
 0xc6a   :  { %3000 = vst.msk [vmem:[#allocation9 + $0x8] sm:$0xff] %vm77_vm0, %v2986_v5 }
 0xc6b   :  { %2999 = vst.msk [vmem:[#allocation9] sm:$0xff] %vm77_vm0, %v2981_v7 }
 0xc9c   :  { %v3346_v8 = vpop.f32.mrb[34].mxu1 }
 0xc9d   :  { %v2996_v9 = vadd.f32 %v3346_v8, %v3074_v14  ;;  %v2990_v11 = vpop.f32.mrb[35].mxu1 }
 0xc9e   :  { %v2991_v12 = vadd.f32 %v3074_v14, %v2990_v11 }
 0xc9f   :  { %3002 = vst.msk [vmem:[#allocation9 + $0x18] sm:$0xff] %vm77_vm0, %v2996_v9 }
 0xca0   :  { %3001 = vst.msk [vmem:[#allocation9 + $0x10] sm:$0xff] %vm77_vm0, %v2991_v12 }
 0xca1   :  { %3525 = shalt.err (!%p3522_p0)
}
 0xca2   :  { %s3526_s25 = scalar_lea.hbm %s3981_s5, 512 }
 0xca3   :  { %p3527_p1 = scmp.ne.s32.totalorder %s3981_s5, %s3526_s25  ;;  %p3530_p2 = scmp.lt.u32.totalorder %s3526_s25, %s3981_s5 }
 0xca5   :  { %p3532_p3 = pnand %p3530_p2, %p3527_p1 }
 0xca7   :  { %3535 = shalt.err (!%p3532_p3)
}
 0xca8   :  { %3014 = dma.vmem_to_hbm [thread:$0]  %s3009_s22, 512, %s3981_s5, [#allocation5], %s3544_s30, %s3544_s30, %s3545_s6  }
 0xca9   :  { %3540 = dma.done.wait [#allocation5], 512  }
 0xcaa   :  { %3541 = vsyncadd [#allocation5], 4294966784 }
 0xcab   :  { %3018 = vsyncpa [#allocation4], 1 }
 0xcac   :  { %3019 = vsyncpa [#allocation7], 1 }
 0xcad   :  { %3020 = vsyncpa [#allocation5], 1 }

</bundles_post_ra>
